<compile_context>
chip_gen: v7x
topology: tpu7x:2x2x1
jax: 0.10.0
libtpu: 0.0.40
codegen_flags: <defaults>
</compile_context>

<pallas_src>
import jax
import jax.numpy as jnp
from jax.experimental import pallas as pl
from jax.experimental.pallas import tpu as pltpu

n_embed = 64
n_hid1 = 32
n_hid2 = 16


# ---------------------------------------------------------------------------
# Fused encoder kernel.  grid = (layer l in {0,1}, K-chunk k of the R*N axis);
# iteration order is all k of layer 0, then all k of layer 1.
#
#   a_ref     (N, TK)  bf16   current K-chunk of A_cat (relation-concatenated src columns)
#   x_ref     (N, F)   f32    raw node features                    (resident)
#   invn_ref  (N, 1)   f32    1 / x_norm                           (resident)
#   embed_ref (F, 64)  f32    embedding weight                     (resident)
#   w1_ref    (64, (R+1)*32)  [root1 | W1_0 | ... | W1_{R-1}]      (resident)
#   w2_ref    (32, (R+1)*16)  [root2 | W2_0 | ... | W2_{R-1}]      (resident)
#   o_ref     (N, 16)  f32    final output (written once, at the last grid step)
# scratch:
#   acc1 (N,32) f32 / acc2 (N,16) f32            per-layer accumulators (root + aggregation)
#   xws1 (R*N,32) bf16 / xws2 (R*N,16) bf16      row-stacked per-relation X @ W_r
# ---------------------------------------------------------------------------
def _encoder_kernel(a_ref, x_ref, invn_ref, embed_ref, w1_ref, w2_ref,
                    o_ref, acc1, acc2, xws1, xws2):
    l = pl.program_id(0)
    k = pl.program_id(1)
    num_k = pl.num_programs(1)

    N = x_ref.shape[0]
    TK = a_ref.shape[1]
    R = xws1.shape[0] // N
    H1 = acc1.shape[1]
    H2 = acc2.shape[1]

    # ---- layer-1 setup (first grid step only) --------------------------------
    @pl.when((l == 0) & (k == 0))
    def _():
        h0 = jnp.dot(x_ref[...], embed_ref[...], preferred_element_type=jnp.float32)
        h0 = h0 * invn_ref[...]                                  # x / x_norm[:, None]
        # one lane-dense matmul: (N, 64) @ (64, (R+1)*32) -> (N, 128)
        xw = jnp.dot(h0, w1_ref[...], preferred_element_type=jnp.float32)
        acc1[...] = xw[:, :H1]                                   # root / self term
        for r in range(R):                                       # vstack_r(X @ W_r), bf16
            xws1[r * N:(r + 1) * N, :] = (
                xw[:, (r + 1) * H1:(r + 2) * H1].astype(xws1.dtype))

    # ---- layer boundary: finalize layer 1, set up layer 2 --------------------
    @pl.when((l == 1) & (k == 0))
    def _():
        h1 = jnp.maximum(acc1[...], 0.0)                         # ReLU, f32 on the VPU
        xw = jnp.dot(h1, w2_ref[...], preferred_element_type=jnp.float32)  # (N, (R+1)*16)
        acc2[...] = xw[:, :H2]
        for r in range(R):
            xws2[r * N:(r + 1) * N, :] = (
                xw[:, (r + 1) * H2:(r + 2) * H2].astype(xws2.dtype))

    # ---- per-chunk aggregation: acc += A_cat[:, chunk] @ XW_stack[chunk, :] ---
    a_blk = a_ref[...]                                           # (N, TK) bf16
    row0 = pl.multiple_of(k * TK, TK)

    @pl.when(l == 0)
    def _():
        acc1[...] += jnp.dot(a_blk, xws1[pl.ds(row0, TK), :],
                             preferred_element_type=jnp.float32)

    @pl.when(l == 1)
    def _():
        acc2[...] += jnp.dot(a_blk, xws2[pl.ds(row0, TK), :],
                             preferred_element_type=jnp.float32)

    # ---- final store (the only narrow store in the whole kernel) -------------
    @pl.when((l == 1) & (k == num_k - 1))
    def _():
        o_ref[...] = jnp.maximum(acc2[...], 0.0)


# ---------------------------------------------------------------------------
# Plain-JAX glue (data-dependent scatter + parameter packing).
# ---------------------------------------------------------------------------
def build_adjacency(edge_index, edge_type, num_et, num_nodes):
    """Dense mean-normalized per-relation adjacency A[r, dst, src] = 1/indeg_r(dst)."""
    src, dst = edge_index[0], edge_index[1]
    adj = jnp.zeros((num_et, num_nodes, num_nodes), jnp.float32)
    adj = adj.at[edge_type, dst, src].add(1.0)
    deg = adj.sum(axis=-1, keepdims=True)
    return adj / jnp.maximum(deg, 1.0)


def _concat_weights(att, basis, root):
    """W_r = sum_b att[r,b] basis[b];  returns [W_root | W_0 | ... | W_{R-1}]."""
    w_rel = jnp.einsum("rb,bio->rio", att, basis,
                       precision=jax.lax.Precision.HIGHEST)
    num_et, in_dim, out_dim = w_rel.shape
    w_rel = jnp.transpose(w_rel, (1, 0, 2)).reshape(in_dim, num_et * out_dim)
    return jnp.concatenate([root, w_rel], axis=1).astype(jnp.float32)


def _pick_k_chunk(rn):
    for cand in (512, 256, 128):        # largest lane-aligned chunk that divides R*N
        if rn % cand == 0:
            return cand
    return rn                            # tiny graphs: single K block (== full dim)


def encoder_forward(params, x, edge_index, edge_type, range_list, x_norm):
    del range_list  # equivalent information is carried by the per-type adjacency split
    num_et = params["att1"].shape[0]
    N, in_dim = x.shape

    adj = build_adjacency(edge_index, edge_type, num_et, N)            # (R, N, N) f32
    # relation-concatenated contraction axis; bf16 storage for the dominant tensor
    a_cat = jnp.transpose(adj, (1, 0, 2)).reshape(N, num_et * N).astype(jnp.bfloat16)
    w_cat1 = _concat_weights(params["att1"], params["basis1"], params["root1"])
    w_cat2 = _concat_weights(params["att2"], params["basis2"], params["root2"])
    inv_norm = (1.0 / x_norm).astype(jnp.float32).reshape(N, 1)

    RN = num_et * N
    tk = _pick_k_chunk(RN)
    num_k = RN // tk

    return pl.pallas_call(
        _encoder_kernel,
        out_shape=jax.ShapeDtypeStruct((N, n_hid2), jnp.float32),
        grid_spec=pltpu.PrefetchScalarGridSpec(
            num_scalar_prefetch=0,
            grid=(2, num_k),                                 # (layer, K-chunk of R*N)
            in_specs=[
                # A_cat streamed chunk-by-chunk (auto double-buffered); it is re-streamed
                # for layer 2 — two passes over the adjacency are inherent to two layers.
                pl.BlockSpec((N, tk), lambda l, k: (0, k)),
                pl.BlockSpec((N, in_dim), lambda l, k: (0, 0)),
                pl.BlockSpec((N, 1), lambda l, k: (0, 0)),
                pl.BlockSpec((in_dim, n_embed), lambda l, k: (0, 0)),
                pl.BlockSpec(w_cat1.shape, lambda l, k: (0, 0)),
                pl.BlockSpec(w_cat2.shape, lambda l, k: (0, 0)),
            ],
            out_specs=pl.BlockSpec((N, n_hid2), lambda l, k: (0, 0)),
            scratch_shapes=[
                pltpu.VMEM((N, n_hid1), jnp.float32),        # acc1
                pltpu.VMEM((N, n_hid2), jnp.float32),        # acc2
                pltpu.VMEM((RN, n_hid1), jnp.bfloat16),      # xws1 = vstack_r(h0 @ W1_r)
                pltpu.VMEM((RN, n_hid2), jnp.bfloat16),      # xws2 = vstack_r(h1 @ W2_r)
            ],
        ),
        compiler_params=pltpu.CompilerParams(
            dimension_semantics=("arbitrary", "arbitrary"),  # both axes are sequential deps
            vmem_limit_bytes=48 * 1024 * 1024,               # fits v7x's 64 MiB/TC VMEM
        ),
    )(a_cat, x.astype(jnp.float32), inv_norm, params["embed"], w_cat1, w_cat2)


# ---------------------------------------------------------------------------
# Pure-JAX reference.  Mirrors the kernel's bf16 storage of the adjacency and of the
# per-relation X@W_r aggregation operands (f32 accumulation) so the comparison is tight.
# ---------------------------------------------------------------------------
def encoder_ref(params, x, edge_index, edge_type, range_list, x_norm):
    del range_list
    num_et = params["att1"].shape[0]
    N = x.shape[0]
    hi = jax.lax.Precision.HIGHEST
    adj = build_adjacency(edge_index, edge_type, num_et, N).astype(jnp.bfloat16)
    h = jnp.dot(x, params["embed"], precision=hi) / x_norm[:, None]
    for att, basis, root in (
        (params["att1"], params["basis1"], params["root1"]),
        (params["att2"], params["basis2"], params["root2"]),
    ):
        w_rel = jnp.einsum("rb,bio->rio", att, basis, precision=hi)
        out = jnp.dot(h, root, precision=hi)
        for r in range(num_et):
            xw = jnp.dot(h, w_rel[r], precision=hi).astype(jnp.bfloat16)
            out = out + jnp.dot(adj[r], xw, preferred_element_type=jnp.float32)
        h = jnp.maximum(out, 0.0)
    return h


def init_params(key, in_dim, num_et, num_base):
    ks = jax.random.split(key, 7)
    def g(k, shape, scale):
        return (scale * jax.random.normal(k, shape)).astype(jnp.float32)
    return {
        "embed":  g(ks[0], (in_dim, n_embed), 1.0),                 # Param.normal_()
        "basis1": g(ks[1], (num_base, n_embed, n_hid1), 1.0 / jnp.sqrt(n_embed)),
        "att1":   g(ks[2], (num_et, num_base), 1.0 / jnp.sqrt(num_base)),
        "root1":  g(ks[3], (n_embed, n_hid1), 1.0 / jnp.sqrt(n_embed)),
        "basis2": g(ks[4], (num_base, n_hid1, n_hid2), 1.0 / jnp.sqrt(n_hid1)),
        "att2":   g(ks[5], (num_et, num_base), 1.0 / jnp.sqrt(num_base)),
        "root2":  g(ks[6], (n_hid1, n_hid2), 1.0 / jnp.sqrt(n_hid1)),
    }


if __name__ == "__main__":
    key = jax.random.PRNGKey(0)
    # N=128 nodes, 3 relations -> R*N = 384 -> 3 K-chunks of 128: exercises the streamed,
    # double-buffered adjacency pipeline while staying small.
    N, in_dim, num_et, num_base, E = 128, 32, 3, 2, 640

    k_x, k_norm, k_src, k_dst, k_et, k_p = jax.random.split(key, 6)
    x = jax.random.normal(k_x, (N, in_dim), jnp.float32)
    x_norm = jax.random.uniform(k_norm, (N,), jnp.float32, 1.0, 2.0)

    edge_type = jnp.sort(jax.random.randint(k_et, (E,), 0, num_et)).astype(jnp.int32)
    edge_index = jnp.stack(
        [jax.random.randint(k_src, (E,), 0, N), jax.random.randint(k_dst, (E,), 0, N)]
    ).astype(jnp.int32)
    # range_list[r] = [start, end) of edges of type r (edge_type is sorted)
    counts = jnp.bincount(edge_type, length=num_et)
    ends = jnp.cumsum(counts)
    range_list = jnp.stack([ends - counts, ends], axis=1).astype(jnp.int32)

    params = init_params(k_p, in_dim, num_et, num_base)

    out = jax.jit(encoder_forward)(params, x, edge_index, edge_type, range_list, x_norm)
    out = jax.block_until_ready(out)

    ref = encoder_ref(params, x, edge_index, edge_type, range_list, x_norm)
    assert out.shape == (N, n_hid2)
    # bf16 storage of the adjacency / aggregation operands (mirrored in the reference)
    # leaves only reduction-order-level differences; tolerance leaves headroom for rare
    # bf16 rounding-boundary flips.
    assert jnp.allclose(out, ref, atol=5e-2, rtol=1e-2), "mismatch vs JAX reference"
    print("KERNEL_OK")
</pallas_src>

<mosaic_0001>
module attributes {stable_mosaic.version = 11 : i64} {
  func.func private @main(%arg0: i32) attributes {dimension_semantics = [#tpu.dimension_semantics<core_parallel>], iteration_bounds = array<i64: 2>, tpu.core_type = #tpu.core_type<sc_scalar_subcore>, window_params = []} {
    return
  }
}

module attributes {stable_mosaic.version = 11 : i64} {
  func.func private @main(%arg0: i32) attributes {dimension_semantics = [#tpu.dimension_semantics<core_parallel>], iteration_bounds = array<i64: 2>, tpu.core_type = #tpu.core_type<sc_scalar_subcore>, window_params = []} {
    return
  }
}

module attributes {stable_mosaic.version = 11 : i64} {
  func.func @_encoder_kernel(%arg0: i32, %arg1: i32, %arg2: memref<128x128xbf16, #tpu.memory_space<vmem>>, %arg3: memref<128x32xf32, #tpu.memory_space<vmem>>, %arg4: memref<128x1xf32, #tpu.memory_space<vmem>>, %arg5: memref<32x64xf32, #tpu.memory_space<vmem>>, %arg6: memref<64x128xf32, #tpu.memory_space<vmem>>, %arg7: memref<32x64xf32, #tpu.memory_space<vmem>>, %arg8: memref<128x16xf32, #tpu.memory_space<vmem>>, %arg9: memref<128x32xf32, #tpu.memory_space<vmem>>, %arg10: memref<128x16xf32, #tpu.memory_space<vmem>>, %arg11: memref<384x32xbf16, #tpu.memory_space<vmem>>, %arg12: memref<384x16xbf16, #tpu.memory_space<vmem>>) attributes {dimension_semantics = [#tpu.dimension_semantics<arbitrary>, #tpu.dimension_semantics<arbitrary>], iteration_bounds = array<i64: 2, 3>, scalar_prefetch = 0 : i64, scratch_operands = 4 : i64, tpu.core_type = #tpu.core_type<tc>, window_params = [{transform_indices = @transform_0, window_bounds = array<i64: 128, 128>}, {pipeline_mode = #tpu.pipeline_mode<synchronous>, transform_indices = @transform_1, window_bounds = array<i64: 128, 32>}, {pipeline_mode = #tpu.pipeline_mode<synchronous>, transform_indices = @transform_2, window_bounds = array<i64: 128, 1>}, {pipeline_mode = #tpu.pipeline_mode<synchronous>, transform_indices = @transform_3, window_bounds = array<i64: 32, 64>}, {pipeline_mode = #tpu.pipeline_mode<synchronous>, transform_indices = @transform_4, window_bounds = array<i64: 64, 128>}, {pipeline_mode = #tpu.pipeline_mode<synchronous>, transform_indices = @transform_5, window_bounds = array<i64: 32, 64>}, {pipeline_mode = #tpu.pipeline_mode<synchronous>, transform_indices = @transform_6, window_bounds = array<i64: 128, 16>}]} {
    %c0_i32 = arith.constant 0 : i32
    %0 = arith.cmpi eq, %arg0, %c0_i32 : i32
    %c0_i32_0 = arith.constant 0 : i32
    %1 = arith.cmpi eq, %arg1, %c0_i32_0 : i32
    %2 = arith.andi %0, %1 : i1
    %3 = arith.extui %2 : i1 to i32
    %c0_i32_1 = arith.constant 0 : i32
    %4 = arith.cmpi ne, %3, %c0_i32_1 : i32
    scf.if %4 {
      %c0_11 = arith.constant 0 : index
      %c0_12 = arith.constant 0 : index
      %24 = vector.load %arg3[%c0_11, %c0_12] : memref<128x32xf32, #tpu.memory_space<vmem>>, vector<128x32xf32>
      %c0_13 = arith.constant 0 : index
      %c0_14 = arith.constant 0 : index
      %25 = vector.load %arg5[%c0_13, %c0_14] : memref<32x64xf32, #tpu.memory_space<vmem>>, vector<32x64xf32>
      %cst = arith.constant dense<0.000000e+00> : vector<128x64xf32>
      %26 = tpu.matmul %24, %25, %cst {dimension_numbers = #tpu.dot_dimension_numbers<[1], [0], [0], [1], [0, 0, 1, 1], [], []>} : vector<128x32xf32>, vector<32x64xf32>, vector<128x64xf32> -> vector<128x64xf32>
      %c0_15 = arith.constant 0 : index
      %c0_16 = arith.constant 0 : index
      %27 = vector.load %arg4[%c0_15, %c0_16] : memref<128x1xf32, #tpu.memory_space<vmem>>, vector<128x1xf32>
      %28 = vector.broadcast %27 : vector<128x1xf32> to vector<128x64xf32>
      %29 = arith.mulf %26, %28 : vector<128x64xf32>
      %c0_17 = arith.constant 0 : index
      %c0_18 = arith.constant 0 : index
      %30 = vector.load %arg6[%c0_17, %c0_18] : memref<64x128xf32, #tpu.memory_space<vmem>>, vector<64x128xf32>
      %cst_19 = arith.constant dense<0.000000e+00> : vector<128x128xf32>
      %31 = tpu.matmul %29, %30, %cst_19 {dimension_numbers = #tpu.dot_dimension_numbers<[1], [0], [0], [1], [0, 0, 1, 1], [], []>} : vector<128x64xf32>, vector<64x128xf32>, vector<128x128xf32> -> vector<128x128xf32>
      %32 = vector.extract_strided_slice %31 {offsets = [0, 0], sizes = [128, 32], strides = [1, 1]} : vector<128x128xf32> to vector<128x32xf32>
      %c0_20 = arith.constant 0 : index
      %c0_21 = arith.constant 0 : index
      %33 = vector.load %arg9[%c0_20, %c0_21] : memref<128x32xf32, #tpu.memory_space<vmem>>, vector<128x32xf32>
      tpu.vector_store %arg9[%c0_20, %c0_21], %32 {strides = array<i32>} : memref<128x32xf32, #tpu.memory_space<vmem>>, vector<128x32xf32>,
      %34 = vector.extract_strided_slice %31 {offsets = [0, 32], sizes = [128, 32], strides = [1, 1]} : vector<128x128xf32> to vector<128x32xf32>
      %35 = arith.truncf %34 : vector<128x32xf32> to vector<128x32xbf16>
      %c0_22 = arith.constant 0 : index
      %c0_23 = arith.constant 0 : index
      %36 = vector.load %arg11[%c0_22, %c0_23] : memref<384x32xbf16, #tpu.memory_space<vmem>>, vector<128x32xbf16>
      tpu.vector_store %arg11[%c0_22, %c0_23], %35 {strides = array<i32>} : memref<384x32xbf16, #tpu.memory_space<vmem>>, vector<128x32xbf16>,
      %37 = vector.extract_strided_slice %31 {offsets = [0, 64], sizes = [128, 32], strides = [1, 1]} : vector<128x128xf32> to vector<128x32xf32>
      %38 = arith.truncf %37 : vector<128x32xf32> to vector<128x32xbf16>
      %c128 = arith.constant 128 : index
      %c0_24 = arith.constant 0 : index
      %39 = vector.load %arg11[%c128, %c0_24] : memref<384x32xbf16, #tpu.memory_space<vmem>>, vector<128x32xbf16>
      tpu.vector_store %arg11[%c128, %c0_24], %38 {strides = array<i32>} : memref<384x32xbf16, #tpu.memory_space<vmem>>, vector<128x32xbf16>,
      %40 = vector.extract_strided_slice %31 {offsets = [0, 96], sizes = [128, 32], strides = [1, 1]} : vector<128x128xf32> to vector<128x32xf32>
      %41 = arith.truncf %40 : vector<128x32xf32> to vector<128x32xbf16>
      %c256 = arith.constant 256 : index
      %c0_25 = arith.constant 0 : index
      %42 = vector.load %arg11[%c256, %c0_25] : memref<384x32xbf16, #tpu.memory_space<vmem>>, vector<128x32xbf16>
      tpu.vector_store %arg11[%c256, %c0_25], %41 {strides = array<i32>} : memref<384x32xbf16, #tpu.memory_space<vmem>>, vector<128x32xbf16>,
    } else {
    }
    %c1_i32 = arith.constant 1 : i32
    %5 = arith.cmpi eq, %arg0, %c1_i32 : i32
    %c0_i32_2 = arith.constant 0 : i32
    %6 = arith.cmpi eq, %arg1, %c0_i32_2 : i32
    %7 = arith.andi %5, %6 : i1
    %8 = arith.extui %7 : i1 to i32
    %c0_i32_3 = arith.constant 0 : i32
    %9 = arith.cmpi ne, %8, %c0_i32_3 : i32
    scf.if %9 {
      %c0_11 = arith.constant 0 : index
      %c0_12 = arith.constant 0 : index
      %24 = vector.load %arg9[%c0_11, %c0_12] : memref<128x32xf32, #tpu.memory_space<vmem>>, vector<128x32xf32>
      %cst = arith.constant 0.000000e+00 : f32
      %25 = vector.broadcast %cst : f32 to vector<128x32xf32>
      %26 = arith.maximumf %24, %25 : vector<128x32xf32>
      %c0_13 = arith.constant 0 : index
      %c0_14 = arith.constant 0 : index
      %27 = vector.load %arg7[%c0_13, %c0_14] : memref<32x64xf32, #tpu.memory_space<vmem>>, vector<32x64xf32>
      %cst_15 = arith.constant dense<0.000000e+00> : vector<128x64xf32>
      %28 = tpu.matmul %26, %27, %cst_15 {dimension_numbers = #tpu.dot_dimension_numbers<[1], [0], [0], [1], [0, 0, 1, 1], [], []>} : vector<128x32xf32>, vector<32x64xf32>, vector<128x64xf32> -> vector<128x64xf32>
      %29 = vector.extract_strided_slice %28 {offsets = [0, 0], sizes = [128, 16], strides = [1, 1]} : vector<128x64xf32> to vector<128x16xf32>
      %c0_16 = arith.constant 0 : index
      %c0_17 = arith.constant 0 : index
      %30 = vector.load %arg10[%c0_16, %c0_17] : memref<128x16xf32, #tpu.memory_space<vmem>>, vector<128x16xf32>
      tpu.vector_store %arg10[%c0_16, %c0_17], %29 {strides = array<i32>} : memref<128x16xf32, #tpu.memory_space<vmem>>, vector<128x16xf32>,
      %31 = vector.extract_strided_slice %28 {offsets = [0, 16], sizes = [128, 16], strides = [1, 1]} : vector<128x64xf32> to vector<128x16xf32>
      %32 = arith.truncf %31 : vector<128x16xf32> to vector<128x16xbf16>
      %c0_18 = arith.constant 0 : index
      %c0_19 = arith.constant 0 : index
      %33 = vector.load %arg12[%c0_18, %c0_19] : memref<384x16xbf16, #tpu.memory_space<vmem>>, vector<128x16xbf16>
      tpu.vector_store %arg12[%c0_18, %c0_19], %32 {strides = array<i32>} : memref<384x16xbf16, #tpu.memory_space<vmem>>, vector<128x16xbf16>,
      %34 = vector.extract_strided_slice %28 {offsets = [0, 32], sizes = [128, 16], strides = [1, 1]} : vector<128x64xf32> to vector<128x16xf32>
      %35 = arith.truncf %34 : vector<128x16xf32> to vector<128x16xbf16>
      %c128 = arith.constant 128 : index
      %c0_20 = arith.constant 0 : index
      %36 = vector.load %arg12[%c128, %c0_20] : memref<384x16xbf16, #tpu.memory_space<vmem>>, vector<128x16xbf16>
      tpu.vector_store %arg12[%c128, %c0_20], %35 {strides = array<i32>} : memref<384x16xbf16, #tpu.memory_space<vmem>>, vector<128x16xbf16>,
      %37 = vector.extract_strided_slice %28 {offsets = [0, 48], sizes = [128, 16], strides = [1, 1]} : vector<128x64xf32> to vector<128x16xf32>
      %38 = arith.truncf %37 : vector<128x16xf32> to vector<128x16xbf16>
      %c256 = arith.constant 256 : index
      %c0_21 = arith.constant 0 : index
      %39 = vector.load %arg12[%c256, %c0_21] : memref<384x16xbf16, #tpu.memory_space<vmem>>, vector<128x16xbf16>
      tpu.vector_store %arg12[%c256, %c0_21], %38 {strides = array<i32>} : memref<384x16xbf16, #tpu.memory_space<vmem>>, vector<128x16xbf16>,
    } else {
    }
    %c0 = arith.constant 0 : index
    %c0_4 = arith.constant 0 : index
    %10 = vector.load %arg2[%c0, %c0_4] : memref<128x128xbf16, #tpu.memory_space<vmem>>, vector<128x128xbf16>
    %c128_i32 = arith.constant 128 : i32
    %11 = arith.muli %arg1, %c128_i32 : i32
    %12 = tpu.assume_multiple %11, 128 : i32
    %c0_i32_5 = arith.constant 0 : i32
    %13 = arith.cmpi eq, %arg0, %c0_i32_5 : i32
    %14 = arith.extui %13 : i1 to i32
    %c0_i32_6 = arith.constant 0 : i32
    %15 = arith.cmpi ne, %14, %c0_i32_6 : i32
    scf.if %15 {
      %c0_11 = arith.constant 0 : index
      %c0_12 = arith.constant 0 : index
      %24 = vector.load %arg9[%c0_11, %c0_12] : memref<128x32xf32, #tpu.memory_space<vmem>>, vector<128x32xf32>
      %25 = arith.index_cast %12 : i32 to index
      %c0_13 = arith.constant 0 : index
      %26 = vector.load %arg11[%25, %c0_13] : memref<384x32xbf16, #tpu.memory_space<vmem>>, vector<128x32xbf16>
      %cst = arith.constant dense<0.000000e+00> : vector<128x32xf32>
      %27 = tpu.matmul %10, %26, %cst {dimension_numbers = #tpu.dot_dimension_numbers<[1], [0], [0], [1], [0, 0, 1, 1], [], []>} : vector<128x128xbf16>, vector<128x32xbf16>, vector<128x32xf32> -> vector<128x32xf32>
      %28 = arith.addf %24, %27 : vector<128x32xf32>
      %c0_14 = arith.constant 0 : index
      %c0_15 = arith.constant 0 : index
      %29 = vector.load %arg9[%c0_14, %c0_15] : memref<128x32xf32, #tpu.memory_space<vmem>>, vector<128x32xf32>
      tpu.vector_store %arg9[%c0_14, %c0_15], %28 {strides = array<i32>} : memref<128x32xf32, #tpu.memory_space<vmem>>, vector<128x32xf32>,
    } else {
    }
    %c1_i32_7 = arith.constant 1 : i32
    %16 = arith.cmpi eq, %arg0, %c1_i32_7 : i32
    %17 = arith.extui %16 : i1 to i32
    %c0_i32_8 = arith.constant 0 : i32
    %18 = arith.cmpi ne, %17, %c0_i32_8 : i32
    scf.if %18 {
      %c0_11 = arith.constant 0 : index
      %c0_12 = arith.constant 0 : index
      %24 = vector.load %arg10[%c0_11, %c0_12] : memref<128x16xf32, #tpu.memory_space<vmem>>, vector<128x16xf32>
      %25 = arith.index_cast %12 : i32 to index
      %c0_13 = arith.constant 0 : index
      %26 = vector.load %arg12[%25, %c0_13] : memref<384x16xbf16, #tpu.memory_space<vmem>>, vector<128x16xbf16>
      %cst = arith.constant dense<0.000000e+00> : vector<128x16xf32>
      %27 = tpu.matmul %10, %26, %cst {dimension_numbers = #tpu.dot_dimension_numbers<[1], [0], [0], [1], [0, 0, 1, 1], [], []>} : vector<128x128xbf16>, vector<128x16xbf16>, vector<128x16xf32> -> vector<128x16xf32>
      %28 = arith.addf %24, %27 : vector<128x16xf32>
      %c0_14 = arith.constant 0 : index
      %c0_15 = arith.constant 0 : index
      %29 = vector.load %arg10[%c0_14, %c0_15] : memref<128x16xf32, #tpu.memory_space<vmem>>, vector<128x16xf32>
      tpu.vector_store %arg10[%c0_14, %c0_15], %28 {strides = array<i32>} : memref<128x16xf32, #tpu.memory_space<vmem>>, vector<128x16xf32>,
    } else {
    }
    %c1_i32_9 = arith.constant 1 : i32
    %19 = arith.cmpi eq, %arg0, %c1_i32_9 : i32
    %c2_i32 = arith.constant 2 : i32
    %20 = arith.cmpi eq, %arg1, %c2_i32 : i32
    %21 = arith.andi %19, %20 : i1
    %22 = arith.extui %21 : i1 to i32
    %c0_i32_10 = arith.constant 0 : i32
    %23 = arith.cmpi ne, %22, %c0_i32_10 : i32
    scf.if %23 {
      %c0_11 = arith.constant 0 : index
      %c0_12 = arith.constant 0 : index
      %24 = vector.load %arg10[%c0_11, %c0_12] : memref<128x16xf32, #tpu.memory_space<vmem>>, vector<128x16xf32>
      %cst = arith.constant 0.000000e+00 : f32
      %25 = vector.broadcast %cst : f32 to vector<128x16xf32>
      %26 = arith.maximumf %24, %25 : vector<128x16xf32>
      %c0_13 = arith.constant 0 : index
      %c0_14 = arith.constant 0 : index
      %27 = vector.load %arg8[%c0_13, %c0_14] : memref<128x16xf32, #tpu.memory_space<vmem>>, vector<128x16xf32>
      tpu.vector_store %arg8[%c0_13, %c0_14], %26 {strides = array<i32>} : memref<128x16xf32, #tpu.memory_space<vmem>>, vector<128x16xf32>,
    } else {
    }
    return
  }
  func.func @transform_0(%arg0: i32, %arg1: i32) -> (i32, i32) {
    %c0_i32 = arith.constant 0 : i32
    %c0_i32_0 = arith.constant 0 : i32
    return %c0_i32, %arg1 : i32, i32
  }
  func.func @transform_1(%arg0: i32, %arg1: i32) -> (i32, i32) {
    %c0_i32 = arith.constant 0 : i32
    %c0_i32_0 = arith.constant 0 : i32
    %c0_i32_1 = arith.constant 0 : i32
    return %c0_i32, %c0_i32_0 : i32, i32
  }
  func.func @transform_2(%arg0: i32, %arg1: i32) -> (i32, i32) {
    %c0_i32 = arith.constant 0 : i32
    %c0_i32_0 = arith.constant 0 : i32
    %c0_i32_1 = arith.constant 0 : i32
    return %c0_i32, %c0_i32_0 : i32, i32
  }
  func.func @transform_3(%arg0: i32, %arg1: i32) -> (i32, i32) {
    %c0_i32 = arith.constant 0 : i32
    %c0_i32_0 = arith.constant 0 : i32
    %c0_i32_1 = arith.constant 0 : i32
    return %c0_i32, %c0_i32_0 : i32, i32
  }
  func.func @transform_4(%arg0: i32, %arg1: i32) -> (i32, i32) {
    %c0_i32 = arith.constant 0 : i32
    %c0_i32_0 = arith.constant 0 : i32
    %c0_i32_1 = arith.constant 0 : i32
    return %c0_i32, %c0_i32_0 : i32, i32
  }
  func.func @transform_5(%arg0: i32, %arg1: i32) -> (i32, i32) {
    %c0_i32 = arith.constant 0 : i32
    %c0_i32_0 = arith.constant 0 : i32
    %c0_i32_1 = arith.constant 0 : i32
    return %c0_i32, %c0_i32_0 : i32, i32
  }
  func.func @transform_6(%arg0: i32, %arg1: i32) -> (i32, i32) {
    %c0_i32 = arith.constant 0 : i32
    %c0_i32_0 = arith.constant 0 : i32
    %c0_i32_1 = arith.constant 0 : i32
    return %c0_i32, %c0_i32_0 : i32, i32
  }
}

</mosaic_0001>

<bundles_post_ra>
// kernel: encoder_forward.1
= control target key start
LH: loop header
LB: loop body
LE: loop exit
PB: predicated region body
PF: predicated region fallthrough
CT: control target
= control target key end

     0   :  { %s2496_s21 = smov 0   ;;  %s2498_s22 = smov 0   ;;  %s3116_s0 = inlined_call_operand.vmem [shape: bf16[128,384], index: 0, kind: input, shape index: {}]   ;;  %s3117_s1 = inlined_call_operand.vmem [shape: f32[128,32], index: 1, kind: input, shape index: {}]   ;;  %s3118_s2 = inlined_call_operand.vmem [shape: f32[128,1], index: 2, kind: input, shape index: {}]   ;;  %s3119_s3 = inlined_call_operand.vmem [shape: f32[32,64], index: 3, kind: input, shape index: {}]   ;;  %s3120_s4 = inlined_call_operand.vmem [shape: f32[64,128], index: 4, kind: input, shape index: {}]   ;;  %s3121_s5 = inlined_call_operand.vmem [shape: f32[32,64], index: 5, kind: input, shape index: {}]   ;;  %s3122_s6 = inlined_call_operand.vmem [shape: f32[128,16], index: 6, kind: output, shape index: {}]  }
   0x1   :  { %s2500_s23 = smov 0   ;;  %s2502_s24 = smov 0  }
   0x2   :  { %s2504_s25 = smov 0   ;;  %s2506_s26 = smov 0  }
   0x3   :  { %s2508_s27 = smov 0  }
   0x4 LB: > { %s25_s28 = sadd.s32 1, %s2444_s25  ;;  %s28_s29 = sadd.s32 1, %s2448_s26  ;;  %s2452_s27 = sphi %s2508_s27, %s16_s27   ;;  %s2448_s26 = sphi %s2506_s26, %s3128_s26   ;;  %s2444_s25 = sphi %s2504_s25, %s3127_s25   ;;  %s2440_s24 = sphi %s2502_s24, %s3126_s24   ;;  %s2436_s23 = sphi %s2500_s23, %s3125_s23   ;;  %s2432_s22 = sphi %s2498_s22, %s3124_s22   ;;  %s2428_s21 = sphi %s2496_s21, %s3123_s21  }
   0x5   : > { %p26_p0 = scmp.ge.s32.totalorder %s25_s28, 3  ;;  %s35_s30 = sadd.s32 1, %s2432_s22 }
   0x6   : > { %p42_p1 = scmp.ne.s32.totalorder %s2432_s22, %s2428_s21  ;;  %p43_p2 = scmp.eq.s32.totalorder %s2452_s27, 0 }
   0x7   : > { %s3130_s28 = smov (%p26_p0, %s25_s28), 0  ;;  %s3132_s29 = smov (!%p26_p0, %s28_s29), %s2448_s26 }
   0x8   : > { %s32_s7 = ssub.s32 %s2444_s25, %s3130_s28  ;;  %p44_p3 = por %p43_p2, %p42_p1 }
   0x9   : > { %p30_p4 = scmp.ge.s32.totalorder %s3132_s29, 2  ;;  %p33_p5 = scmp.eq.s32.totalorder %s32_s7, 0 }
   0xa   : > { %p1917_p6 = scmp.ge.s32.totalorder %s2452_s27, 6 }
   0xb   : > { %s3134_s29 = smov (%p30_p4, %s3132_s29), 0 }
   0xc   : > { %s2545_s8 = scalar_select %p33_p5, %s2432_s22, %s35_s30  }
   0xd   : > { %209 = sbr.rel (%p1917_p6) target bundleno = 34 (0x22), region = 36 }
  0x14   : > { %212 = sbr.rel (!%p44_p3) target bundleno = 34 (0x22), region = 40  ;;  %s214_s9 = sand.u32 (%p44_p3), 1, %s2432_s22  }
  0x15   : > { %s1919_s10 = sshll.u32 (%p44_p3), %s2444_s25, 2  ;;  %s1918_s11 = sshll.u32 (%p44_p3), %s214_s9, 6 }
  0x16   : > { %s2553_s14 = scalar_lea.vmem (%p44_p3), %s3116_s0, %s1919_s10  ;;  %s216_s15 = scalar_lea.vmem (%p44_p3), [#allocation6], %s1918_s11 }
  0x17   : > { %v234_v0 = vld [vmem:[%s2553_s14] sm:$0xf] (%p44_p3)  ;;  %v236_v1 = vld [vmem:[%s2553_s14 + $0xc] sm:$0xf] (%p44_p3)  ;;  %v238_v2 = vld [vmem:[%s2553_s14 + $0x18] sm:$0xf] (%p44_p3) }
  0x18   : > { %235 = vst [vmem:[%s216_s15] sm:$0xf] (%p44_p3), %v234_v0  ;;  %237 = vst [vmem:[%s216_s15 + $0x4] sm:$0xf] (%p44_p3), %v236_v1  ;;  %v240_v3 = vld [vmem:[%s2553_s14 + $0x24] sm:$0xf] (%p44_p3) }
  0x19   : > { %v242_v4 = vld [vmem:[%s2553_s14 + $0x30] sm:$0xf] (%p44_p3)  ;;  %239 = vst [vmem:[%s216_s15 + $0x8] sm:$0xf] (%p44_p3), %v238_v2  ;;  %241 = vst [vmem:[%s216_s15 + $0xc] sm:$0xf] (%p44_p3), %v240_v3 }
  0x1a   : > { %243 = vst [vmem:[%s216_s15 + $0x10] sm:$0xf] (%p44_p3), %v242_v4  ;;  %v244_v5 = vld [vmem:[%s2553_s14 + $0x3c] sm:$0xf] (%p44_p3)  ;;  %v246_v6 = vld [vmem:[%s2553_s14 + $0x48] sm:$0xf] (%p44_p3) }
  0x1b   : > { %v248_v7 = vld [vmem:[%s2553_s14 + $0x54] sm:$0xf]  ;;  %245 = vst [vmem:[%s216_s15 + $0x14] sm:$0xf] %v244_v5  ;;  %247 = vst [vmem:[%s216_s15 + $0x18] sm:$0xf] %v246_v6 }
  0x1c   : > { %249 = vst [vmem:[%s216_s15 + $0x1c] sm:$0xf] %v248_v7  ;;  %v250_v8 = vld [vmem:[%s2553_s14 + $0x60] sm:$0xf]  ;;  %v252_v9 = vld [vmem:[%s2553_s14 + $0x6c] sm:$0xf] }
  0x1d   : > { %v254_v10 = vld [vmem:[%s2553_s14 + $0x78] sm:$0xf]  ;;  %251 = vst [vmem:[%s216_s15 + $0x20] sm:$0xf] %v250_v8  ;;  %253 = vst [vmem:[%s216_s15 + $0x24] sm:$0xf] %v252_v9 }
  0x1e   : > { %255 = vst [vmem:[%s216_s15 + $0x28] sm:$0xf] %v254_v10  ;;  %v256_v11 = vld [vmem:[%s2553_s14 + $0x84] sm:$0xf]  ;;  %v258_v12 = vld [vmem:[%s2553_s14 + $0x90] sm:$0xf] }
  0x1f   : > { %v260_v13 = vld [vmem:[%s2553_s14 + $0x9c] sm:$0xf]  ;;  %257 = vst [vmem:[%s216_s15 + $0x2c] sm:$0xf] %v256_v11  ;;  %259 = vst [vmem:[%s216_s15 + $0x30] sm:$0xf] %v258_v12 }
  0x20   : > { %261 = vst [vmem:[%s216_s15 + $0x34] sm:$0xf] %v260_v13  ;;  %v262_v14 = vld [vmem:[%s2553_s14 + $0xa8] sm:$0xf]  ;;  %v264_v15 = vld [vmem:[%s2553_s14 + $0xb4] sm:$0xf] }
  0x21   : > { %263 = vst [vmem:[%s216_s15 + $0x38] sm:$0xf] %v262_v14  ;;  %265 = vst [vmem:[%s216_s15 + $0x3c] sm:$0xf] %v264_v15 }
  0x22 PF: > { %p1920_p7 = scmp.ge.s32.totalorder %s2452_s27, 1  ;;  %p319_p8 = scmp.lt.s32.totalorder %s2452_s27, 7 }
  0x24   : > { %p320_p9 = pnand %p1920_p7, %p319_p8 }
  0x25   : > { %s326_s16 = sand.u32 (!%p320_p9), 1, %s2428_s21   ;;  %p351_p10 = scmp.eq.s32.totalorder (!%p320_p9), %s2440_s24, 0 }
  0x26   : > { %323 = sbr.rel (%p320_p9) target bundleno = 1590 (0x636), region = 81  ;;  %s1921_s17 = sshll.u32 (!%p320_p9), %s326_s16, 6 }
  0x27   : > { %p352_p11 = scmp.eq.s32.totalorder (!%p320_p9), %s2436_s23, 0  ;;  %s2578_s18 = scalar_lea.vmem (!%p320_p9), [#allocation6], %s1921_s17 }
  0x29   : > { %p353_p12 = pnand (!%p320_p9), %p352_p11, %p351_p10 }
  0x2d   : > { %356 = sbr.rel (%p353_p12) target bundleno = 651 (0x28b), region = 89  ;;  %v373_v16 = vld [vmem:[%s3119_s3] sm:$0xff] (!%p353_p12)  ;;  %v374_v17 = vld [vmem:[%s3119_s3 + $0x8] sm:$0xff] (!%p353_p12)  ;;  %v375_v18 = vld [vmem:[%s3119_s3 + $0x10] sm:$0xff] (!%p353_p12)  ;;  %vm377_vm0 = vcmask (!%p353_p12), 261120   ;;  %v2454_v22 = vmov (!%p353_p12), 0  }
  0x2e   : > { %v2257_v19 = vpack.c.bf16 (!%p353_p12), %v374_v17, %v373_v16  ;;  %v376_v20 = vld [vmem:[%s3119_s3 + $0x18] sm:$0xff] (!%p353_p12)  ;;  %v357_v21 = vld [vmem:[%s3117_s1] sm:$0xff] (!%p353_p12)  ;;  %2396 = vset.pattern.permute.xlu0 (!%p353_p12), %v2454_v22  ;;  %2397 = vset.pattern.permute.xlu1 (!%p353_p12), %v2454_v22  ;;  %v573_v24 = vld [vmem:[%s3118_s2 + $0x10] sm:$0xff] (!%p353_p12)  ;;  %vm691_vm1 = vcmask (!%p353_p12), 523264   ;;  %s2455_s9 = smov (!%p353_p12), 96   ;;  %s2456_s10 = smov (!%p353_p12), 64  }
  0x2f   : > { %v2261_v23 = vpack.c.bf16 (!%p353_p12), %v376_v20, %v375_v18  ;;  %2097 = vmatprep.mubr.msk.f32.mxu0 (!%p353_p12), %vm377_vm0, %v357_v21  ;;  %599 = vperm.xlu0 (!%p353_p12), %2396, %v573_v24   ;;  %v358_v25 = vld [vmem:[%s3117_s1 + $0x8] sm:$0xff] (!%p353_p12)  ;;  %v574_v26 = vld [vmem:[%s3118_s2 + $0x18] sm:$0xff] (!%p353_p12)  ;;  %v359_v27 = vld [vmem:[%s3117_s1 + $0x10] sm:$0xff] (!%p353_p12)  ;;  %s2457_s21 = smov (!%p353_p12), 32  }
  0x30   : > { %2258 = vmatprep.subr.bf16.mxu0 (!%p353_p12), %v2257_v19  ;;  %v575_v28 = vld [vmem:[%s3118_s2 + $0x20] sm:$0xff] (!%p353_p12)  ;;  %v576_v29 = vld [vmem:[%s3118_s2 + $0x28] sm:$0xff] (!%p353_p12)  ;;  %v360_v30 = vld [vmem:[%s3117_s1 + $0x18] sm:$0xff] (!%p353_p12) }
  0x31   : > { %2260 = vmatpush3.bf16.msra.mxu0 (!%p353_p12), %v2257_v19  ;;  %609 = vperm.xlu1 (!%p353_p12), %2397, %v575_v28   ;;  %v577_v31 = vld [vmem:[%s3118_s2 + $0x30] sm:$0xff] (!%p353_p12)  ;;  %v361_v32 = vld [vmem:[%s3117_s1 + $0x20] sm:$0xff] (!%p353_p12)  ;;  %v578_v33 = vld [vmem:[%s3118_s2 + $0x38] sm:$0xff] (!%p353_p12) }
  0x32   : > { %2262 = vmatprep.subr.bf16.mxu0 (!%p353_p12), %v2261_v23  ;;  %v362_v34 = vld [vmem:[%s3117_s1 + $0x28] sm:$0xff] (!%p353_p12)  ;;  %v579_v35 = vld [vmem:[%s3118_s2 + $0x40] sm:$0xff] (!%p353_p12)  ;;  %v363_v36 = vld [vmem:[%s3117_s1 + $0x30] sm:$0xff] (!%p353_p12) }
  0x33   : > { %604 = vperm.xlu0 (!%p353_p12), %2396, %v574_v26   ;;  %v580_v37 = vld [vmem:[%s3118_s2 + $0x48] sm:$0xff] (!%p353_p12)  ;;  %v364_v38 = vld [vmem:[%s3117_s1 + $0x38] sm:$0xff] (!%p353_p12)  ;;  %v581_v39 = vld [vmem:[%s3118_s2 + $0x50] sm:$0xff] (!%p353_p12) }
  0x34   : > { %v365_v40 = vld [vmem:[%s3117_s1 + $0x40] sm:$0xff]  ;;  %v582_v41 = vld [vmem:[%s3118_s2 + $0x58] sm:$0xff]  ;;  %v366_v42 = vld [vmem:[%s3117_s1 + $0x48] sm:$0xff] }
  0x35   : > { %2264 = vmatpush3.bf16.msra.mxu0 %v2261_v23  ;;  %614 = vperm.xlu1 %2397, %v576_v29   ;;  %v583_v43 = vld [vmem:[%s3118_s2 + $0x60] sm:$0xff]  ;;  %v367_v44 = vld [vmem:[%s3117_s1 + $0x50] sm:$0xff]  ;;  %v584_v45 = vld [vmem:[%s3118_s2 + $0x68] sm:$0xff] }
  0x36   : > { %v368_v46 = vld [vmem:[%s3117_s1 + $0x58] sm:$0xff]  ;;  %v571_v47 = vld [vmem:[%s3118_s2] sm:$0xff]  ;;  %v684_v50 = vld [vmem:[%s3120_s4 + $0x8] sm:$0xff] }
  0x37   : > { %619 = vperm.xlu0 %2396, %v577_v31   ;;  %v369_v48 = vld [vmem:[%s3117_s1 + $0x60] sm:$0xff]  ;;  %v585_v51 = vld [vmem:[%s3118_s2 + $0x70] sm:$0xff]  ;;  %v370_v53 = vld [vmem:[%s3117_s1 + $0x68] sm:$0xff] }
  0x38   : > { %2098 = vmatmul.mubr.msk.f32.vlgmr.msra.gmra.mrb[0].mxu0 %vm377_vm0, %v358_v25  ;;  %v683_v49 = vld [vmem:[%s3120_s4] sm:$0xff]  ;;  %v572_v54 = vld [vmem:[%s3118_s2 + $0x8] sm:$0xff]  ;;  %v371_v55 = vld [vmem:[%s3117_s1 + $0x70] sm:$0xff] }
  0x39   : > { %2100 = vmatprep.mubr.msk.f32.mxu0 %vm377_vm0, %v359_v27  ;;  %624 = vperm.xlu1 %2397, %v578_v33   ;;  %v2265_v52 = vpack.c.bf16 %v684_v50, %v683_v49  ;;  %v685_v56 = vld [vmem:[%s3120_s4 + $0x10] sm:$0xff]  ;;  %v686_v57 = vld [vmem:[%s3120_s4 + $0x18] sm:$0xff]  ;;  %v687_v58 = vld [vmem:[%s3120_s4 + $0x20] sm:$0xff] }
  0x3a   : > { %v586_v59 = vld [vmem:[%s3118_s2 + $0x78] sm:$0xff]  ;;  %v2269_v60 = vpack.c.bf16 %v686_v57, %v685_v56  ;;  %v688_v61 = vld [vmem:[%s3120_s4 + $0x28] sm:$0xff]  ;;  %v689_v0 = vld [vmem:[%s3120_s4 + $0x30] sm:$0xff] }
  0x3b   : > { %629 = vperm.xlu0 %2396, %v579_v35   ;;  %2266 = vmatprep.subr.bf16.mxu0 %v2265_v52  ;;  %v372_v62 = vld [vmem:[%s3117_s1 + $0x78] sm:$0xff]  ;;  %v2273_v63 = vpack.c.bf16 %v688_v61, %v687_v58 }
  0x3c   : > { %2101 = vmatmul.mubr.msk.f32.gmra.mrb[2].mxu0 %vm377_vm0, %v360_v30  ;;  %2289 = vmatprep.subr.bf16.mxu1 %v2265_v52  ;;  %v690_v1 = vld [vmem:[%s3120_s4 + $0x38] sm:$0xff] }
  0x3d   : > { %2103 = vmatprep.mubr.msk.f32.mxu0 %vm377_vm0, %v361_v32  ;;  %634 = vperm.xlu1 %2397, %v580_v37   ;;  %v2277_v2 = vpack.c.bf16 %v690_v1, %v689_v0 }
  0x3e   : > { %2268 = vmatpush3.bf16.msra.mxu0 %v2265_v52  ;;  %2293 = vmatpush3.bf16.msra.mxu1 %v2265_v52 }
  0x3f   : > { %639 = vperm.xlu0 %2396, %v581_v39   ;;  %2270 = vmatprep.subr.bf16.mxu0 %v2269_v60 }
  0x40   : > { %2104 = vmatmul.mubr.msk.f32.gmra.mrb[4].mxu0 %vm377_vm0, %v362_v34  ;;  %2290 = vmatprep.subr.bf16.mxu1 %v2269_v60 }
  0x41   : > { %2106 = vmatprep.mubr.msk.f32.mxu0 %vm377_vm0, %v363_v36  ;;  %644 = vperm.xlu1 %2397, %v582_v41  }
  0x42   : > { %2272 = vmatpush3.bf16.msra.mxu0 %v2269_v60  ;;  %2294 = vmatpush3.bf16.msra.mxu1 %v2269_v60 }
  0x43   : > { %649 = vperm.xlu0 %2396, %v583_v43   ;;  %2274 = vmatprep.subr.bf16.mxu0 %v2273_v63 }
  0x44   : > { %2107 = vmatmul.mubr.msk.f32.gmra.mrb[6].mxu0 %vm377_vm0, %v364_v38  ;;  %2291 = vmatprep.subr.bf16.mxu1 %v2273_v63 }
  0x45   : > { %2109 = vmatprep.mubr.msk.f32.mxu0 %vm377_vm0, %v365_v40  ;;  %654 = vperm.xlu1 %2397, %v584_v45  }
  0x46   : > { %2276 = vmatpush3.bf16.msra.mxu0 %v2273_v63  ;;  %2295 = vmatpush3.bf16.msra.mxu1 %v2273_v63 }
  0x47   : > { %589 = vperm.xlu0 %2396, %v571_v47   ;;  %2278 = vmatprep.subr.bf16.mxu0 %v2277_v2 }
  0x48   : > { %2110 = vmatmul.mubr.msk.f32.gmra.mrb[8].mxu0 %vm377_vm0, %v366_v42  ;;  %2292 = vmatprep.subr.bf16.mxu1 %v2277_v2 }
  0x49   : > { %2112 = vmatprep.mubr.msk.f32.mxu0 %vm377_vm0, %v367_v44  ;;  %659 = vperm.xlu1 %2397, %v585_v51  }
  0x4a   : > { %2280 = vmatpush3.bf16.msra.mxu0 %v2277_v2  ;;  %2296 = vmatpush3.bf16.msra.mxu1 %v2277_v2 }
  0x4b   : > { %594 = vperm.xlu0 %2396, %v572_v54  }
  0x4c   : > { %2113 = vmatmul.mubr.msk.f32.gmra.mrb[10].mxu0 %vm377_vm0, %v368_v46 }
  0x4d   : > { %2115 = vmatprep.mubr.msk.f32.mxu0 %vm377_vm0, %v369_v48  ;;  %664 = vperm.xlu1 %2397, %v586_v59  }
  0x50   : > { %2116 = vmatmul.mubr.msk.f32.gmra.mrb[12].mxu0 %vm377_vm0, %v370_v53 }
  0x51   : > { %2118 = vmatprep.mubr.msk.f32.mxu0 %vm377_vm0, %v371_v55 }
  0x54   : > { %2119 = vmatmul.mubr.msk.f32.gmra.mrb[14].mxu0 %vm377_vm0, %v372_v62 }
  0xae   : > { %v600_v3 = vpop.permute.xlu0 %599 }
  0xb0   : > { %v610_v8 = vpop.permute.xlu1 %609 }
  0xb2   : > { %v605_v4 = vpop.permute.xlu0 %604 }
  0xb4   : > { %v615_v10 = vpop.permute.xlu1 %614 }
  0xb6   : > { %v620_v5 = vpop.permute.xlu0 %619 }
  0xb8   : > { %v625_v12 = vpop.permute.xlu1 %624 }
  0xba   : > { %v630_v6 = vpop.permute.xlu0 %629 }
  0xbc   : > { %v635_v20 = vpop.permute.xlu1 %634 }
  0xbe   : > { %v640_v7 = vpop.permute.xlu0 %639 }
  0xc0   : > { %v645_v27 = vpop.permute.xlu1 %644 }
  0xc2   : > { %v650_v9 = vpop.permute.xlu0 %649 }
  0xc4   : > { %v655_v34 = vpop.permute.xlu1 %654 }
  0xc6   : > { %v590_v11 = vpop.permute.xlu0 %589 }
  0xc8   : > { %v660_v41 = vpop.permute.xlu1 %659 }
  0xca   : > { %v595_v15 = vpop.permute.xlu0 %594 }
  0xcc   : > { %v665_v48 = vpop.permute.xlu1 %664 }
 0x10b   : > { %v2099_v13 = vpop.f32.mrb[0].mxu0 }
 0x10c   : > { %v492_v14 = vpop.f32.mrb[1].mxu0  ;;  %v668_v17 = vmul.f32 %v2099_v13, %v595_v15 }
 0x10d   : > { %v667_v16 = vmul.f32 %v590_v11, %v492_v14 }
 0x10f   : > { %v2102_v18 = vpop.f32.mrb[2].mxu0  ;;  %2137 = vmatprep.mubr.msk.f32.mxu0 %vm691_vm1, %v667_v16 }
 0x110   : > { %v502_v19 = vpop.f32.mrb[3].mxu0  ;;  %2138 = vmatmul.mubr.msk.f32.vlgmr.msra.gmra.mrb[16].mxu0 %vm691_vm1, %v668_v17  ;;  %v670_v22 = vmul.f32 %v2102_v18, %v605_v4 }
 0x111   : > { %v669_v21 = vmul.f32 %v600_v3, %v502_v19 }
 0x113   : > { %v2105_v23 = vpop.f32.mrb[4].mxu0  ;;  %2140 = vmatprep.mubr.msk.f32.mxu1 %vm691_vm1, %v669_v21 }
 0x114   : > { %v672_v24 = vmul.f32 %v2105_v23, %v615_v10  ;;  %v512_v25 = vpop.f32.mrb[5].mxu0  ;;  %2141 = vmatmul.mubr.msk.f32.vlgmr.msra.gmra.mrb[0].mxu1 %vm691_vm1, %v670_v22 }
 0x115   : > { %v671_v26 = vmul.f32 %v610_v8, %v512_v25 }
 0x117   : > { %v2108_v28 = vpop.f32.mrb[6].mxu0  ;;  %2143 = vmatprep.mubr.msk.f32.mxu1 %vm691_vm1, %v671_v26 }
 0x118   : > { %v522_v29 = vpop.f32.mrb[7].mxu0  ;;  %2144 = vmatmul.mubr.msk.f32.gmra.mrb[2].mxu1 %vm691_vm1, %v672_v24  ;;  %v674_v31 = vmul.f32 %v2108_v28, %v625_v12 }
 0x119   : > { %v673_v30 = vmul.f32 %v620_v5, %v522_v29 }
 0x11b   : > { %v2111_v32 = vpop.f32.mrb[8].mxu0  ;;  %2146 = vmatprep.mubr.msk.f32.mxu1 %vm691_vm1, %v673_v30 }
 0x11c   : > { %v532_v33 = vpop.f32.mrb[9].mxu0  ;;  %2147 = vmatmul.mubr.msk.f32.gmra.mrb[4].mxu1 %vm691_vm1, %v674_v31  ;;  %v676_v36 = vmul.f32 %v2111_v32, %v635_v20 }
 0x11d   : > { %v675_v35 = vmul.f32 %v630_v6, %v532_v33 }
 0x11f   : > { %v2114_v37 = vpop.f32.mrb[10].mxu0  ;;  %2149 = vmatprep.mubr.msk.f32.mxu1 %vm691_vm1, %v675_v35 }
 0x120   : > { %v542_v38 = vpop.f32.mrb[11].mxu0  ;;  %2150 = vmatmul.mubr.msk.f32.gmra.mrb[6].mxu1 %vm691_vm1, %v676_v36  ;;  %v678_v40 = vmul.f32 %v2114_v37, %v645_v27 }
 0x121   : > { %v677_v39 = vmul.f32 %v640_v7, %v542_v38 }
 0x123   : > { %v2117_v42 = vpop.f32.mrb[12].mxu0  ;;  %2152 = vmatprep.mubr.msk.f32.mxu1 %vm691_vm1, %v677_v39 }
 0x124   : > { %v552_v43 = vpop.f32.mrb[13].mxu0  ;;  %2153 = vmatmul.mubr.msk.f32.gmra.mrb[8].mxu1 %vm691_vm1, %v678_v40  ;;  %v680_v45 = vmul.f32 %v2117_v42, %v655_v34 }
 0x125   : > { %v679_v44 = vmul.f32 %v650_v9, %v552_v43 }
 0x127   : > { %v2120_v46 = vpop.f32.mrb[14].mxu0  ;;  %2155 = vmatprep.mubr.msk.f32.mxu1 %vm691_vm1, %v679_v44 }
 0x128   : > { %v562_v47 = vpop.f32.mrb[15].mxu0  ;;  %2156 = vmatmul.mubr.msk.f32.gmra.mrb[10].mxu1 %vm691_vm1, %v680_v45  ;;  %v682_v50 = vmul.f32 %v2120_v46, %v665_v48 }
 0x129   : > { %v681_v49 = vmul.f32 %v660_v41, %v562_v47 }
 0x12b   : > { %2158 = vmatprep.mubr.msk.f32.mxu1 %vm691_vm1, %v681_v49 }
 0x12c   : > { %2159 = vmatmul.mubr.msk.f32.gmra.mrb[12].mxu1 %vm691_vm1, %v682_v50 }
 0x1e3   : > { %v2139_v51 = vpop.f32.mrb[16].mxu0 }
 0x1e4   : > { %886 = vst.msk [vmem:[#allocation2 + $0x8] sm:$0xff] %vm377_vm0, %v2139_v51  ;;  %v806_v52 = vpop.f32.mrb[17].mxu0 }
 0x1e5   : > { %885 = vst.msk [vmem:[#allocation2] sm:$0xff] %vm377_vm0, %v806_v52  ;;  %v901_v53 = vpack.c.bf16 %v2139_v51, %v806_v52 }
 0x1e7   : > { %v2142_v54 = vpop.f32.mrb[0].mxu1  ;;  %917 = vrot.lane.b32.xlu0 %v901_v53, %s2455_s9 }
 0x1e8   : > { %888 = vst.msk [vmem:[#allocation2 + $0x18] sm:$0xff] %vm377_vm0, %v2142_v54  ;;  %v816_v55 = vpop.f32.mrb[1].mxu1 }
 0x1e9   : > { %887 = vst.msk [vmem:[#allocation2 + $0x10] sm:$0xff] %vm377_vm0, %v816_v55  ;;  %v902_v56 = vpack.c.bf16 %v2142_v54, %v816_v55 }
 0x1eb   : > { %919 = vrot.lane.b32.xlu1 %v902_v56, %s2455_s9  ;;  %v2145_v57 = vpop.f32.mrb[2].mxu1  ;;  %949 = vrot.lane.b32.xlu0 %v901_v53, %s2456_s10 }
 0x1ec   : > { %890 = vst.msk [vmem:[#allocation2 + $0x28] sm:$0xff] %vm377_vm0, %v2145_v57  ;;  %v826_v58 = vpop.f32.mrb[3].mxu1 }
 0x1ed   : > { %889 = vst.msk [vmem:[#allocation2 + $0x20] sm:$0xff] %vm377_vm0, %v826_v58  ;;  %v903_v59 = vpack.c.bf16 %v2145_v57, %v826_v58 }
 0x1ef   : > { %951 = vrot.lane.b32.xlu1 %v902_v56, %s2456_s10  ;;  %v2148_v60 = vpop.f32.mrb[4].mxu1  ;;  %981 = vrot.lane.b32.xlu0 %v901_v53, %s2457_s21 }
 0x1f0   : > { %892 = vst.msk [vmem:[#allocation2 + $0x38] sm:$0xff] %vm377_vm0, %v2148_v60  ;;  %v836_v61 = vpop.f32.mrb[5].mxu1 }
 0x1f1   : > { %891 = vst.msk [vmem:[#allocation2 + $0x30] sm:$0xff] %vm377_vm0, %v836_v61  ;;  %v904_v62 = vpack.c.bf16 %v2148_v60, %v836_v61 }
 0x1f3   : > { %983 = vrot.lane.b32.xlu1 %v902_v56, %s2457_s21  ;;  %v2151_v63 = vpop.f32.mrb[6].mxu1  ;;  %921 = vrot.lane.b32.xlu0 %v903_v59, %s2455_s9 }
 0x1f4   : > { %894 = vst.msk [vmem:[#allocation2 + $0x48] sm:$0xff] %vm377_vm0, %v2151_v63  ;;  %v846_v0 = vpop.f32.mrb[7].mxu1 }
 0x1f5   : > { %893 = vst.msk [vmem:[#allocation2 + $0x40] sm:$0xff] %vm377_vm0, %v846_v0  ;;  %v905_v1 = vpack.c.bf16 %v2151_v63, %v846_v0 }
 0x1f7   : > { %923 = vrot.lane.b32.xlu1 %v904_v62, %s2455_s9  ;;  %v2154_v2 = vpop.f32.mrb[8].mxu1  ;;  %953 = vrot.lane.b32.xlu0 %v903_v59, %s2456_s10 }
 0x1f8   : > { %896 = vst.msk [vmem:[#allocation2 + $0x58] sm:$0xff] %vm377_vm0, %v2154_v2  ;;  %v856_v3 = vpop.f32.mrb[9].mxu1 }
 0x1f9   : > { %895 = vst.msk [vmem:[#allocation2 + $0x50] sm:$0xff] %vm377_vm0, %v856_v3  ;;  %v906_v4 = vpack.c.bf16 %v2154_v2, %v856_v3 }
 0x1fb   : > { %955 = vrot.lane.b32.xlu1 %v904_v62, %s2456_s10  ;;  %v2157_v5 = vpop.f32.mrb[10].mxu1  ;;  %985 = vrot.lane.b32.xlu0 %v903_v59, %s2457_s21 }
 0x1fc   : > { %898 = vst.msk [vmem:[#allocation2 + $0x68] sm:$0xff] %vm377_vm0, %v2157_v5  ;;  %v866_v6 = vpop.f32.mrb[11].mxu1 }
 0x1fd   : > { %897 = vst.msk [vmem:[#allocation2 + $0x60] sm:$0xff] %vm377_vm0, %v866_v6  ;;  %v907_v7 = vpack.c.bf16 %v2157_v5, %v866_v6 }
 0x1ff   : > { %987 = vrot.lane.b32.xlu1 %v904_v62, %s2457_s21  ;;  %925 = vrot.lane.b32.xlu0 %v905_v1, %s2455_s9  ;;  %v2160_v8 = vpop.f32.mrb[12].mxu1 }
 0x200   : > { %900 = vst.msk [vmem:[#allocation2 + $0x78] sm:$0xff] %vm377_vm0, %v2160_v8  ;;  %v876_v9 = vpop.f32.mrb[13].mxu1 }
 0x201   : > { %899 = vst.msk [vmem:[#allocation2 + $0x70] sm:$0xff] %vm377_vm0, %v876_v9  ;;  %v908_v10 = vpack.c.bf16 %v2160_v8, %v876_v9 }
 0x203   : > { %927 = vrot.lane.b32.xlu1 %v906_v4, %s2455_s9  ;;  %957 = vrot.lane.b32.xlu0 %v905_v1, %s2456_s10 }
 0x207   : > { %959 = vrot.lane.b32.xlu1 %v906_v4, %s2456_s10  ;;  %989 = vrot.lane.b32.xlu0 %v905_v1, %s2457_s21 }
 0x20b   : > { %991 = vrot.lane.b32.xlu1 %v906_v4, %s2457_s21  ;;  %929 = vrot.lane.b32.xlu0 %v907_v7, %s2455_s9 }
 0x20f   : > { %961 = vrot.lane.b32.xlu0 %v907_v7, %s2456_s10  ;;  %931 = vrot.lane.b32.xlu1 %v908_v10, %s2455_s9 }
 0x213   : > { %993 = vrot.lane.b32.xlu0 %v907_v7, %s2457_s21  ;;  %963 = vrot.lane.b32.xlu1 %v908_v10, %s2456_s10 }
 0x217   : > { %995 = vrot.lane.b32.xlu1 %v908_v10, %s2457_s21 }
 0x259   : > { %v918_v11 = vpop.permute.xlu0 %917 }
 0x25a   : > { %941 = vst.msk [vmem:[#allocation4] sm:$0xff] %vm377_vm0, %v918_v11 }
 0x25d   : > { %v920_v12 = vpop.permute.xlu1 %919  ;;  %v950_v13 = vpop.permute.xlu0 %949 }
 0x25e   : > { %942 = vst.msk [vmem:[#allocation4 + $0x8] sm:$0xff] %vm377_vm0, %v920_v12  ;;  %973 = vst.msk [vmem:[#allocation4 + $0x40] sm:$0xff] %vm377_vm0, %v950_v13 }
 0x261   : > { %v952_v14 = vpop.permute.xlu1 %951  ;;  %v982_v15 = vpop.permute.xlu0 %981 }
 0x262   : > { %974 = vst.msk [vmem:[#allocation4 + $0x48] sm:$0xff] %vm377_vm0, %v952_v14  ;;  %1005 = vst.msk [vmem:[#allocation4 + $0x80] sm:$0xff] %vm377_vm0, %v982_v15 }
 0x265   : > { %v984_v16 = vpop.permute.xlu1 %983  ;;  %v922_v17 = vpop.permute.xlu0 %921 }
 0x266   : > { %1006 = vst.msk [vmem:[#allocation4 + $0x88] sm:$0xff] %vm377_vm0, %v984_v16  ;;  %943 = vst.msk [vmem:[#allocation4 + $0x10] sm:$0xff] %vm377_vm0, %v922_v17 }
 0x269   : > { %v924_v18 = vpop.permute.xlu1 %923  ;;  %v954_v19 = vpop.permute.xlu0 %953 }
 0x26a   : > { %944 = vst.msk [vmem:[#allocation4 + $0x18] sm:$0xff] %vm377_vm0, %v924_v18  ;;  %975 = vst.msk [vmem:[#allocation4 + $0x50] sm:$0xff] %vm377_vm0, %v954_v19 }
 0x26d   : > { %v956_v20 = vpop.permute.xlu1 %955  ;;  %v986_v21 = vpop.permute.xlu0 %985 }
 0x26e   : > { %976 = vst.msk [vmem:[#allocation4 + $0x58] sm:$0xff] %vm377_vm0, %v956_v20  ;;  %1007 = vst.msk [vmem:[#allocation4 + $0x90] sm:$0xff] %vm377_vm0, %v986_v21 }
 0x271   : > { %v988_v22 = vpop.permute.xlu1 %987  ;;  %v926_v23 = vpop.permute.xlu0 %925 }
 0x272   : > { %1008 = vst.msk [vmem:[#allocation4 + $0x98] sm:$0xff] %vm377_vm0, %v988_v22  ;;  %945 = vst.msk [vmem:[#allocation4 + $0x20] sm:$0xff] %vm377_vm0, %v926_v23 }
 0x275   : > { %v928_v24 = vpop.permute.xlu1 %927  ;;  %v958_v25 = vpop.permute.xlu0 %957 }
 0x276   : > { %946 = vst.msk [vmem:[#allocation4 + $0x28] sm:$0xff] %vm377_vm0, %v928_v24  ;;  %977 = vst.msk [vmem:[#allocation4 + $0x60] sm:$0xff] %vm377_vm0, %v958_v25 }
 0x279   : > { %v960_v26 = vpop.permute.xlu1 %959  ;;  %v990_v27 = vpop.permute.xlu0 %989 }
 0x27a   : > { %978 = vst.msk [vmem:[#allocation4 + $0x68] sm:$0xff] %vm377_vm0, %v960_v26  ;;  %1009 = vst.msk [vmem:[#allocation4 + $0xa0] sm:$0xff] %vm377_vm0, %v990_v27 }
 0x27d   : > { %v992_v28 = vpop.permute.xlu1 %991  ;;  %v930_v29 = vpop.permute.xlu0 %929 }
 0x27e   : > { %1010 = vst.msk [vmem:[#allocation4 + $0xa8] sm:$0xff] %vm377_vm0, %v992_v28  ;;  %947 = vst.msk [vmem:[#allocation4 + $0x30] sm:$0xff] %vm377_vm0, %v930_v29 }
 0x281   : > { %v962_v30 = vpop.permute.xlu0 %961  ;;  %v932_v31 = vpop.permute.xlu1 %931 }
 0x282   : > { %979 = vst.msk [vmem:[#allocation4 + $0x70] sm:$0xff] %vm377_vm0, %v962_v30  ;;  %948 = vst.msk [vmem:[#allocation4 + $0x38] sm:$0xff] %vm377_vm0, %v932_v31 }
 0x285   : > { %v994_v32 = vpop.permute.xlu0 %993  ;;  %v964_v33 = vpop.permute.xlu1 %963 }
 0x286   : > { %1011 = vst.msk [vmem:[#allocation4 + $0xb0] sm:$0xff] %vm377_vm0, %v994_v32  ;;  %980 = vst.msk [vmem:[#allocation4 + $0x78] sm:$0xff] %vm377_vm0, %v964_v33 }
 0x289   : > { %v996_v34 = vpop.permute.xlu1 %995 }
 0x28a   : > { %1012 = vst.msk [vmem:[#allocation4 + $0xb8] sm:$0xff] %vm377_vm0, %v996_v34 }
 0x28b PF: > { %p1013_p13 = scmp.eq.s32.totalorder %s2440_s24, 1 }
 0x28d   : > { %p1014_p0 = pnand %p1013_p13, %p352_p11 }
 0x28e   : > { %v1050_v35 = vld [vmem:[%s3121_s5] sm:$0xff] (!%p1014_p0)  ;;  %v1051_v36 = vld [vmem:[%s3121_s5 + $0x8] sm:$0xff] (!%p1014_p0)  ;;  %v1052_v37 = vld [vmem:[%s3121_s5 + $0x10] sm:$0xff] (!%p1014_p0)  ;;  %vm1054_vm2 = vcmask (!%p1014_p0), 261120   ;;  %vm1248_vm3 = vcmask (!%p1014_p0), 130048   ;;  %s2458_s20 = smov (!%p1014_p0), 112  }
 0x28f   : > { %1017 = sbr.rel (%p1014_p0) target bundleno = 1044 (0x414), region = 93  ;;  %v2281_v38 = vpack.c.bf16 (!%p1014_p0), %v1051_v36, %v1050_v35  ;;  %v1053_v39 = vld [vmem:[%s3121_s5 + $0x18] sm:$0xff] (!%p1014_p0)  ;;  %v1018_v40 = vld [vmem:[#allocation2] sm:$0xff] (!%p1014_p0)  ;;  %v1019_v45 = vld [vmem:[#allocation2 + $0x8] sm:$0xff] (!%p1014_p0)  ;;  %s2459_s30 = smov (!%p1014_p0), 96  }
 0x290   : > { %v1026_v41 = vld [vmem:[#allocation2 + $0x40] sm:$0xff] (!%p1014_p0)  ;;  %v2285_v42 = vpack.c.bf16 (!%p1014_p0), %v1053_v39, %v1052_v37  ;;  %v1034_v43 = vmax.f32 (!%p1014_p0), %v1018_v40, 0.0  ;;  %v1027_v46 = vld [vmem:[#allocation2 + $0x48] sm:$0xff] (!%p1014_p0)  ;;  %v1028_v47 = vld [vmem:[#allocation2 + $0x50] sm:$0xff] (!%p1014_p0)  ;;  %v1035_v49 = vmax.f32 (!%p1014_p0), %v1019_v45, 0.0  ;;  %s2460_s7 = smov (!%p1014_p0), 80  }
 0x291   : > { %v1042_v44 = vmax.f32 (!%p1014_p0), %v1026_v41, 0.0  ;;  %2282 = vmatprep.subr.bf16.mxu0 (!%p1014_p0), %v2281_v38  ;;  %2297 = vmatprep.subr.bf16.mxu1 (!%p1014_p0), %v2281_v38  ;;  %v1020_v48 = vld [vmem:[#allocation2 + $0x10] sm:$0xff] (!%p1014_p0)  ;;  %v1043_v50 = vmax.f32 (!%p1014_p0), %v1027_v46, 0.0  ;;  %v1044_v51 = vmax.f32 (!%p1014_p0), %v1028_v47, 0.0  ;;  %v1029_v52 = vld [vmem:[#allocation2 + $0x58] sm:$0xff] (!%p1014_p0)  ;;  %v1022_v55 = vld [vmem:[#allocation2 + $0x20] sm:$0xff] (!%p1014_p0) }
 0x292   : > { %2284 = vmatpush3.bf16.msra.mxu0 (!%p1014_p0), %v2281_v38  ;;  %2299 = vmatpush3.bf16.msra.mxu1 (!%p1014_p0), %v2281_v38  ;;  %v1036_v53 = vmax.f32 (!%p1014_p0), %v1020_v48, 0.0  ;;  %v1021_v54 = vld [vmem:[#allocation2 + $0x18] sm:$0xff] (!%p1014_p0)  ;;  %v1030_v56 = vld [vmem:[#allocation2 + $0x60] sm:$0xff] (!%p1014_p0)  ;;  %v1045_v57 = vmax.f32 (!%p1014_p0), %v1029_v52, 0.0  ;;  %v1038_v59 = vmax.f32 (!%p1014_p0), %v1022_v55, 0.0  ;;  %v1023_v60 = vld [vmem:[#allocation2 + $0x28] sm:$0xff] (!%p1014_p0) }
 0x293   : > { %2286 = vmatprep.subr.bf16.mxu0 (!%p1014_p0), %v2285_v42  ;;  %2298 = vmatprep.subr.bf16.mxu1 (!%p1014_p0), %v2285_v42  ;;  %v1037_v58 = vmax.f32 (!%p1014_p0), %v1021_v54, 0.0  ;;  %v1046_v61 = vmax.f32 (!%p1014_p0), %v1030_v56, 0.0  ;;  %v1031_v62 = vld [vmem:[#allocation2 + $0x68] sm:$0xff] (!%p1014_p0)  ;;  %v1024_v63 = vld [vmem:[#allocation2 + $0x30] sm:$0xff] (!%p1014_p0)  ;;  %v1039_v1 = vmax.f32 (!%p1014_p0), %v1023_v60, 0.0  ;;  %v1025_v4 = vld [vmem:[#allocation2 + $0x38] sm:$0xff] (!%p1014_p0) }
 0x294   : > { %2169 = vmatprep.mubr.msk.f32.mxu0 (!%p1014_p0), %vm1054_vm2, %v1034_v43  ;;  %2181 = vmatprep.mubr.msk.f32.mxu1 (!%p1014_p0), %vm1054_vm2, %v1042_v44  ;;  %v1032_v0 = vld [vmem:[#allocation2 + $0x70] sm:$0xff] (!%p1014_p0)  ;;  %v1047_v2 = vmax.f32 (!%p1014_p0), %v1031_v62, 0.0  ;;  %v1040_v3 = vmax.f32 (!%p1014_p0), %v1024_v63, 0.0  ;;  %v1033_v6 = vld [vmem:[#allocation2 + $0x78] sm:$0xff] (!%p1014_p0)  ;;  %v1041_v7 = vmax.f32 (!%p1014_p0), %v1025_v4, 0.0 }
 0x295   : > { %v1048_v5 = vmax.f32 (!%p1014_p0), %v1032_v0, 0.0  ;;  %v1049_v8 = vmax.f32 (!%p1014_p0), %v1033_v6, 0.0 }
 0x296   : > { %2288 = vmatpush3.bf16.msra.mxu0 %v2285_v42  ;;  %2300 = vmatpush3.bf16.msra.mxu1 %v2285_v42 }
 0x299   : > { %2170 = vmatmul.mubr.msk.f32.vlgmr.msra.gmra.mrb[0].mxu0 %vm1054_vm2, %v1035_v49  ;;  %2182 = vmatmul.mubr.msk.f32.vlgmr.msra.gmra.mrb[0].mxu1 %vm1054_vm2, %v1043_v50 }
 0x29a   : > { %2184 = vmatprep.mubr.msk.f32.mxu1 %vm1054_vm2, %v1044_v51  ;;  %2172 = vmatprep.mubr.msk.f32.mxu0 %vm1054_vm2, %v1036_v53 }
 0x29d   : > { %2185 = vmatmul.mubr.msk.f32.gmra.mrb[2].mxu1 %vm1054_vm2, %v1045_v57  ;;  %2173 = vmatmul.mubr.msk.f32.gmra.mrb[2].mxu0 %vm1054_vm2, %v1037_v58 }
 0x29e   : > { %2175 = vmatprep.mubr.msk.f32.mxu0 %vm1054_vm2, %v1038_v59  ;;  %2187 = vmatprep.mubr.msk.f32.mxu1 %vm1054_vm2, %v1046_v61 }
 0x2a1   : > { %2176 = vmatmul.mubr.msk.f32.gmra.mrb[4].mxu0 %vm1054_vm2, %v1039_v1  ;;  %2188 = vmatmul.mubr.msk.f32.gmra.mrb[4].mxu1 %vm1054_vm2, %v1047_v2 }
 0x2a2   : > { %2178 = vmatprep.mubr.msk.f32.mxu0 %vm1054_vm2, %v1040_v3  ;;  %2190 = vmatprep.mubr.msk.f32.mxu1 %vm1054_vm2, %v1048_v5 }
 0x2a5   : > { %2179 = vmatmul.mubr.msk.f32.gmra.mrb[6].mxu0 %vm1054_vm2, %v1041_v7  ;;  %2191 = vmatmul.mubr.msk.f32.gmra.mrb[6].mxu1 %vm1054_vm2, %v1049_v8 }
 0x36c   : > { %v2171_v9 = vpop.f32.mrb[0].mxu0  ;;  %v2183_v10 = vpop.f32.mrb[0].mxu1 }
 0x36d   : > { %1250 = vst.msk [vmem:[#allocation3 + $0x8] sm:$0xff] %vm1248_vm3, %v2171_v9  ;;  %1258 = vst.msk [vmem:[#allocation3 + $0x48] sm:$0xff] %vm1248_vm3, %v2183_v10  ;;  %v1169_v11 = vpop.f32.mrb[1].mxu0  ;;  %v1209_v12 = vpop.f32.mrb[1].mxu1 }
 0x36e   : > { %1249 = vst.msk [vmem:[#allocation3] sm:$0xff] %vm1248_vm3, %v1169_v11  ;;  %v1265_v13 = vpack.c.bf16 %v2171_v9, %v1169_v11  ;;  %1257 = vst.msk [vmem:[#allocation3 + $0x40] sm:$0xff] %vm1248_vm3, %v1209_v12  ;;  %v1269_v14 = vpack.c.bf16 %v2183_v10, %v1209_v12 }
 0x370   : > { %v2186_v15 = vpop.f32.mrb[2].mxu1  ;;  %1281 = vrot.lane.b32.xlu0 %v1265_v13, %s2458_s20  ;;  %v2174_v16 = vpop.f32.mrb[2].mxu0 }
 0x371   : > { %1260 = vst.msk [vmem:[#allocation3 + $0x58] sm:$0xff] %vm1248_vm3, %v2186_v15  ;;  %v1219_v17 = vpop.f32.mrb[3].mxu1  ;;  %1252 = vst.msk [vmem:[#allocation3 + $0x18] sm:$0xff] %vm1248_vm3, %v2174_v16  ;;  %v1179_v18 = vpop.f32.mrb[3].mxu0 }
 0x372   : > { %1259 = vst.msk [vmem:[#allocation3 + $0x50] sm:$0xff] %vm1248_vm3, %v1219_v17  ;;  %v1270_v19 = vpack.c.bf16 %v2186_v15, %v1219_v17  ;;  %1251 = vst.msk [vmem:[#allocation3 + $0x10] sm:$0xff] %vm1248_vm3, %v1179_v18  ;;  %v1266_v20 = vpack.c.bf16 %v2174_v16, %v1179_v18 }
 0x374   : > { %1291 = vrot.lane.b32.xlu1 %v1270_v19, %s2458_s20  ;;  %1289 = vrot.lane.b32.xlu0 %v1269_v14, %s2458_s20  ;;  %v2177_v21 = vpop.f32.mrb[4].mxu0  ;;  %v2189_v22 = vpop.f32.mrb[4].mxu1 }
 0x375   : > { %1254 = vst.msk [vmem:[#allocation3 + $0x28] sm:$0xff] %vm1248_vm3, %v2177_v21  ;;  %v1189_v23 = vpop.f32.mrb[5].mxu0  ;;  %1262 = vst.msk [vmem:[#allocation3 + $0x68] sm:$0xff] %vm1248_vm3, %v2189_v22  ;;  %v1229_v24 = vpop.f32.mrb[5].mxu1 }
 0x376   : > { %1253 = vst.msk [vmem:[#allocation3 + $0x20] sm:$0xff] %vm1248_vm3, %v1189_v23  ;;  %v1267_v25 = vpack.c.bf16 %v2177_v21, %v1189_v23  ;;  %1261 = vst.msk [vmem:[#allocation3 + $0x60] sm:$0xff] %vm1248_vm3, %v1229_v24  ;;  %v1271_v26 = vpack.c.bf16 %v2189_v22, %v1229_v24 }
 0x378   : > { %1313 = vrot.lane.b32.xlu0 %v1265_v13, %s2459_s30  ;;  %1315 = vrot.lane.b32.xlu1 %v1266_v20, %s2459_s30  ;;  %v2180_v27 = vpop.f32.mrb[6].mxu0  ;;  %v2192_v28 = vpop.f32.mrb[6].mxu1 }
 0x379   : > { %1256 = vst.msk [vmem:[#allocation3 + $0x38] sm:$0xff] %vm1248_vm3, %v2180_v27  ;;  %v1199_v29 = vpop.f32.mrb[7].mxu0  ;;  %1264 = vst.msk [vmem:[#allocation3 + $0x78] sm:$0xff] %vm1248_vm3, %v2192_v28  ;;  %v1239_v30 = vpop.f32.mrb[7].mxu1 }
 0x37a   : > { %1255 = vst.msk [vmem:[#allocation3 + $0x30] sm:$0xff] %vm1248_vm3, %v1199_v29  ;;  %v1268_v31 = vpack.c.bf16 %v2180_v27, %v1199_v29  ;;  %1263 = vst.msk [vmem:[#allocation3 + $0x70] sm:$0xff] %vm1248_vm3, %v1239_v30  ;;  %v1272_v32 = vpack.c.bf16 %v2192_v28, %v1239_v30 }
 0x37c   : > { %1321 = vrot.lane.b32.xlu0 %v1269_v14, %s2459_s30  ;;  %1323 = vrot.lane.b32.xlu1 %v1270_v19, %s2459_s30 }
 0x380   : > { %1345 = vrot.lane.b32.xlu0 %v1265_v13, %s2460_s7  ;;  %1347 = vrot.lane.b32.xlu1 %v1266_v20, %s2460_s7 }
 0x384   : > { %1353 = vrot.lane.b32.xlu0 %v1269_v14, %s2460_s7  ;;  %1355 = vrot.lane.b32.xlu1 %v1270_v19, %s2460_s7 }
 0x388   : > { %1283 = vrot.lane.b32.xlu0 %v1266_v20, %s2458_s20  ;;  %1285 = vrot.lane.b32.xlu1 %v1267_v25, %s2458_s20 }
 0x38c   : > { %1293 = vrot.lane.b32.xlu0 %v1271_v26, %s2458_s20  ;;  %1287 = vrot.lane.b32.xlu1 %v1268_v31, %s2458_s20 }
 0x390   : > { %1317 = vrot.lane.b32.xlu0 %v1267_v25, %s2459_s30  ;;  %1295 = vrot.lane.b32.xlu1 %v1272_v32, %s2458_s20 }
 0x394   : > { %1325 = vrot.lane.b32.xlu0 %v1271_v26, %s2459_s30  ;;  %1319 = vrot.lane.b32.xlu1 %v1268_v31, %s2459_s30 }
 0x398   : > { %1349 = vrot.lane.b32.xlu0 %v1267_v25, %s2460_s7  ;;  %1327 = vrot.lane.b32.xlu1 %v1272_v32, %s2459_s30 }
 0x39c   : > { %1357 = vrot.lane.b32.xlu0 %v1271_v26, %s2460_s7  ;;  %1351 = vrot.lane.b32.xlu1 %v1268_v31, %s2460_s7 }
 0x3a0   : > { %1359 = vrot.lane.b32.xlu1 %v1272_v32, %s2460_s7 }
 0x3e2   : > { %v1282_v33 = vpop.permute.xlu0 %1281 }
 0x3e3   : > { %1305 = vst.msk [vmem:[#allocation5] sm:$0xff] %vm1248_vm3, %v1282_v33 }
 0x3e6   : > { %v1292_v34 = vpop.permute.xlu1 %1291  ;;  %v1290_v35 = vpop.permute.xlu0 %1289 }
 0x3e7   : > { %1310 = vst.msk [vmem:[#allocation5 + $0x28] sm:$0xff] %vm1248_vm3, %v1292_v34  ;;  %1309 = vst.msk [vmem:[#allocation5 + $0x20] sm:$0xff] %vm1248_vm3, %v1290_v35 }
 0x3ea   : > { %v1314_v36 = vpop.permute.xlu0 %1313  ;;  %v1316_v37 = vpop.permute.xlu1 %1315 }
 0x3eb   : > { %1337 = vst.msk [vmem:[#allocation5 + $0x40] sm:$0xff] %vm1248_vm3, %v1314_v36  ;;  %1338 = vst.msk [vmem:[#allocation5 + $0x48] sm:$0xff] %vm1248_vm3, %v1316_v37 }
 0x3ee   : > { %v1322_v38 = vpop.permute.xlu0 %1321  ;;  %v1324_v39 = vpop.permute.xlu1 %1323 }
 0x3ef   : > { %1341 = vst.msk [vmem:[#allocation5 + $0x60] sm:$0xff] %vm1248_vm3, %v1322_v38  ;;  %1342 = vst.msk [vmem:[#allocation5 + $0x68] sm:$0xff] %vm1248_vm3, %v1324_v39 }
 0x3f2   : > { %v1346_v40 = vpop.permute.xlu0 %1345  ;;  %v1348_v41 = vpop.permute.xlu1 %1347 }
 0x3f3   : > { %1369 = vst.msk [vmem:[#allocation5 + $0x80] sm:$0xff] %vm1248_vm3, %v1346_v40  ;;  %1370 = vst.msk [vmem:[#allocation5 + $0x88] sm:$0xff] %vm1248_vm3, %v1348_v41 }
 0x3f6   : > { %v1354_v42 = vpop.permute.xlu0 %1353  ;;  %v1356_v43 = vpop.permute.xlu1 %1355 }
 0x3f7   : > { %1373 = vst.msk [vmem:[#allocation5 + $0xa0] sm:$0xff] %vm1248_vm3, %v1354_v42  ;;  %1374 = vst.msk [vmem:[#allocation5 + $0xa8] sm:$0xff] %vm1248_vm3, %v1356_v43 }
 0x3fa   : > { %v1284_v44 = vpop.permute.xlu0 %1283  ;;  %v1286_v45 = vpop.permute.xlu1 %1285 }
 0x3fb   : > { %1306 = vst.msk [vmem:[#allocation5 + $0x8] sm:$0xff] %vm1248_vm3, %v1284_v44  ;;  %1307 = vst.msk [vmem:[#allocation5 + $0x10] sm:$0xff] %vm1248_vm3, %v1286_v45 }
 0x3fe   : > { %v1294_v46 = vpop.permute.xlu0 %1293  ;;  %v1288_v47 = vpop.permute.xlu1 %1287 }
 0x3ff   : > { %1311 = vst.msk [vmem:[#allocation5 + $0x30] sm:$0xff] %vm1248_vm3, %v1294_v46  ;;  %1308 = vst.msk [vmem:[#allocation5 + $0x18] sm:$0xff] %vm1248_vm3, %v1288_v47 }
 0x402   : > { %v1318_v48 = vpop.permute.xlu0 %1317  ;;  %v1296_v49 = vpop.permute.xlu1 %1295 }
 0x403   : > { %1339 = vst.msk [vmem:[#allocation5 + $0x50] sm:$0xff] %vm1248_vm3, %v1318_v48  ;;  %1312 = vst.msk [vmem:[#allocation5 + $0x38] sm:$0xff] %vm1248_vm3, %v1296_v49 }
 0x406   : > { %v1326_v50 = vpop.permute.xlu0 %1325  ;;  %v1320_v51 = vpop.permute.xlu1 %1319 }
 0x407   : > { %1343 = vst.msk [vmem:[#allocation5 + $0x70] sm:$0xff] %vm1248_vm3, %v1326_v50  ;;  %1340 = vst.msk [vmem:[#allocation5 + $0x58] sm:$0xff] %vm1248_vm3, %v1320_v51 }
 0x40a   : > { %v1350_v52 = vpop.permute.xlu0 %1349  ;;  %v1328_v53 = vpop.permute.xlu1 %1327 }
 0x40b   : > { %1371 = vst.msk [vmem:[#allocation5 + $0x90] sm:$0xff] %vm1248_vm3, %v1350_v52  ;;  %1344 = vst.msk [vmem:[#allocation5 + $0x78] sm:$0xff] %vm1248_vm3, %v1328_v53 }
 0x40e   : > { %v1358_v54 = vpop.permute.xlu0 %1357  ;;  %v1352_v55 = vpop.permute.xlu1 %1351 }
 0x40f   : > { %1375 = vst.msk [vmem:[#allocation5 + $0xb0] sm:$0xff] %vm1248_vm3, %v1358_v54  ;;  %1372 = vst.msk [vmem:[#allocation5 + $0x98] sm:$0xff] %vm1248_vm3, %v1352_v55 }
 0x412   : > { %v1360_v56 = vpop.permute.xlu1 %1359 }
 0x413   : > { %1376 = vst.msk [vmem:[#allocation5 + $0xb8] sm:$0xff] %vm1248_vm3, %v1360_v56 }
 0x414 PF: > { %v2890_v57 = vld [vmem:[%s2578_s18] sm:$0xf]  ;;  %v2893_v58 = vld [vmem:[%s2578_s18 + $0x4] sm:$0xf]  ;;  %v2896_v59 = vld [vmem:[%s2578_s18 + $0x8] sm:$0xf] }
 0x415   : > { %v2899_v60 = vld [vmem:[%s2578_s18 + $0xc] sm:$0xf]  ;;  %v2902_v61 = vld [vmem:[%s2578_s18 + $0x10] sm:$0xf]  ;;  %v2905_v62 = vld [vmem:[%s2578_s18 + $0x14] sm:$0xf] }
 0x416   : > { %v2908_v63 = vld [vmem:[%s2578_s18 + $0x18] sm:$0xf]  ;;  %v2911_v0 = vld [vmem:[%s2578_s18 + $0x1c] sm:$0xf]  ;;  %v2914_v1 = vld [vmem:[%s2578_s18 + $0x20] sm:$0xf] }
 0x417   : > { %v2917_v2 = vld [vmem:[%s2578_s18 + $0x24] sm:$0xf]  ;;  %v2920_v3 = vld [vmem:[%s2578_s18 + $0x28] sm:$0xf]  ;;  %v2923_v4 = vld [vmem:[%s2578_s18 + $0x2c] sm:$0xf] }
 0x418   : > { %v2926_v5 = vld [vmem:[%s2578_s18 + $0x30] sm:$0xf]  ;;  %v2929_v6 = vld [vmem:[%s2578_s18 + $0x34] sm:$0xf]  ;;  %v2932_v7 = vld [vmem:[%s2578_s18 + $0x38] sm:$0xf] }
 0x419   : > { %v2935_v8 = vld [vmem:[%s2578_s18 + $0x3c] sm:$0xf]  ;;  %s1970_s9 = sshll.u32 %s2436_s23, 7  ;;  %p1971_p1 = scmp.ne.s32.totalorder %s2440_s24, 0 }
 0x41a   : > { %s1413_s10 = sshra.s32 (!%p1971_p1), %s1970_s9, 4  ;;  %v1973_v9 = vcombine.low (!%p1971_p1), %v2890_v57, %v2893_v58  ;;  %v1977_v10 = vcombine.low (!%p1971_p1), %v2914_v1, %v2917_v2  ;;  %v1974_v19 = vcombine.low (!%p1971_p1), %v2896_v59, %v2899_v60  ;;  %v1978_v20 = vcombine.low (!%p1971_p1), %v2920_v3, %v2923_v4  ;;  %v1399_v25 = vld [vmem:[#allocation2 + $0x10] sm:$0xff] (!%p1971_p1)  ;;  %v1397_v27 = vld [vmem:[#allocation2] sm:$0xff] (!%p1971_p1)  ;;  %v1400_v31 = vld [vmem:[#allocation2 + $0x18] sm:$0xff] (!%p1971_p1) }
 0x41b   : > { %1396 = sbr.rel (%p1971_p1) target bundleno = 1312 (0x520), region = 97  ;;  %s1972_s21 = sshll.u32 (!%p1971_p1), %s1413_s10, 3  ;;  %v1975_v21 = vcombine.low (!%p1971_p1), %v2902_v61, %v2905_v62  ;;  %v1979_v22 = vcombine.low (!%p1971_p1), %v2926_v5, %v2929_v6  ;;  %v1976_v23 = vcombine.low (!%p1971_p1), %v2908_v63, %v2911_v0  ;;  %v1980_v24 = vcombine.low (!%p1971_p1), %v2932_v7, %v2935_v8  ;;  %v1407_v26 = vld [vmem:[#allocation2 + $0x50] sm:$0xff] (!%p1971_p1)  ;;  %v1405_v28 = vld [vmem:[#allocation2 + $0x40] sm:$0xff] (!%p1971_p1)  ;;  %v1408_v32 = vld [vmem:[#allocation2 + $0x58] sm:$0xff] (!%p1971_p1) }
 0x41c   : > { %2209 = vmatprep.mubr.bf16.mxu0 (!%p1971_p1), %v1973_v9  ;;  %2217 = vmatprep.mubr.bf16.mxu1 (!%p1971_p1), %v1977_v10  ;;  %s2945_s11 = scalar_lea.vmem (!%p1971_p1), [#allocation4], %s1972_s21  ;;  %vm1586_vm4 = vcmask (!%p1971_p1), 261120   ;;  %v1398_v37 = vld [vmem:[#allocation2 + $0x8] sm:$0xff] (!%p1971_p1)  ;;  %v1403_v49 = vld [vmem:[#allocation2 + $0x30] sm:$0xff] (!%p1971_p1)  ;;  %v1401_v51 = vld [vmem:[#allocation2 + $0x20] sm:$0xff] (!%p1971_p1) }
 0x41d   : > { %v1417_v11 = vld [vmem:[%s2945_s11] sm:$0xff] (!%p1971_p1)  ;;  %v1418_v12 = vld [vmem:[%s2945_s11 + $0x8] sm:$0xff] (!%p1971_p1)  ;;  %v1419_v13 = vld [vmem:[%s2945_s11 + $0x10] sm:$0xff] (!%p1971_p1) }
 0x41e   : > { %2193 = vmatprep.subr.bf16.mxu0 (!%p1971_p1), %v1417_v11  ;;  %2301 = vmatprep.subr.bf16.mxu1 (!%p1971_p1), %v1417_v11  ;;  %v1420_v14 = vld [vmem:[%s2945_s11 + $0x18] sm:$0xff] (!%p1971_p1)  ;;  %v1421_v15 = vld [vmem:[%s2945_s11 + $0x20] sm:$0xff] (!%p1971_p1)  ;;  %v1422_v16 = vld [vmem:[%s2945_s11 + $0x28] sm:$0xff] (!%p1971_p1) }
 0x41f   : > { %2194 = vmatpush3.bf16.msra.mxu0 (!%p1971_p1), %v1417_v11  ;;  %2309 = vmatpush3.bf16.msra.mxu1 (!%p1971_p1), %v1417_v11  ;;  %v1423_v17 = vld [vmem:[%s2945_s11 + $0x30] sm:$0xff] (!%p1971_p1)  ;;  %v1424_v18 = vld [vmem:[%s2945_s11 + $0x38] sm:$0xff] (!%p1971_p1)  ;;  %v1406_v38 = vld [vmem:[#allocation2 + $0x48] sm:$0xff] (!%p1971_p1) }
 0x420   : > { %2195 = vmatprep.subr.bf16.mxu0 (!%p1971_p1), %v1418_v12  ;;  %2302 = vmatprep.subr.bf16.mxu1 (!%p1971_p1), %v1418_v12  ;;  %v1411_v50 = vld [vmem:[#allocation2 + $0x70] sm:$0xff] (!%p1971_p1)  ;;  %v1409_v52 = vld [vmem:[#allocation2 + $0x60] sm:$0xff] (!%p1971_p1)  ;;  %v1404_v55 = vld [vmem:[#allocation2 + $0x38] sm:$0xff] (!%p1971_p1) }
 0x421   : > { %v1412_v56 = vld [vmem:[#allocation2 + $0x78] sm:$0xff] (!%p1971_p1) }
 0x423   : > { %2196 = vmatpush3.bf16.msra.mxu0 %v1418_v12  ;;  %2310 = vmatpush3.bf16.msra.mxu1 %v1418_v12 }
 0x424   : > { %2197 = vmatprep.subr.bf16.mxu0 %v1419_v13  ;;  %2303 = vmatprep.subr.bf16.mxu1 %v1419_v13 }
 0x427   : > { %2198 = vmatpush3.bf16.msra.mxu0 %v1419_v13  ;;  %2311 = vmatpush3.bf16.msra.mxu1 %v1419_v13  ;;  %v1402_v13 = vld [vmem:[#allocation2 + $0x28] sm:$0xff] }
 0x428   : > { %2199 = vmatprep.subr.bf16.mxu0 %v1420_v14  ;;  %2304 = vmatprep.subr.bf16.mxu1 %v1420_v14 }
 0x42b   : > { %2200 = vmatpush3.bf16.msra.mxu0 %v1420_v14  ;;  %2312 = vmatpush3.bf16.msra.mxu1 %v1420_v14  ;;  %v1410_v14 = vld [vmem:[#allocation2 + $0x68] sm:$0xff] }
 0x42c   : > { %2201 = vmatprep.subr.bf16.mxu0 %v1421_v15  ;;  %2305 = vmatprep.subr.bf16.mxu1 %v1421_v15 }
 0x42f   : > { %2202 = vmatpush3.bf16.msra.mxu0 %v1421_v15  ;;  %2313 = vmatpush3.bf16.msra.mxu1 %v1421_v15 }
 0x430   : > { %2203 = vmatprep.subr.bf16.mxu0 %v1422_v16  ;;  %2306 = vmatprep.subr.bf16.mxu1 %v1422_v16 }
 0x433   : > { %2204 = vmatpush3.bf16.msra.mxu0 %v1422_v16  ;;  %2314 = vmatpush3.bf16.msra.mxu1 %v1422_v16 }
 0x434   : > { %2205 = vmatprep.subr.bf16.mxu0 %v1423_v17  ;;  %2307 = vmatprep.subr.bf16.mxu1 %v1423_v17 }
 0x437   : > { %2206 = vmatpush3.bf16.msra.mxu0 %v1423_v17  ;;  %2315 = vmatpush3.bf16.msra.mxu1 %v1423_v17 }
 0x438   : > { %2207 = vmatprep.subr.bf16.mxu0 %v1424_v18  ;;  %2308 = vmatprep.subr.bf16.mxu1 %v1424_v18 }
 0x43b   : > { %2208 = vmatpush3.bf16.msra.mxu0 %v1424_v18  ;;  %2316 = vmatpush3.bf16.msra.mxu1 %v1424_v18 }
 0x43e   : > { %2210 = vmatmul.mubr.bf16.vlgmr.msra.gmra.mrb[0].mxu0 %v1974_v19  ;;  %2218 = vmatmul.mubr.bf16.vlgmr.msra.gmra.mrb[0].mxu1 %v1978_v20 }
 0x43f   : > { %2213 = vmatprep.mubr.bf16.mxu0 %v1975_v21  ;;  %2221 = vmatprep.mubr.bf16.mxu1 %v1979_v22 }
 0x446   : > { %2214 = vmatmul.mubr.bf16.gmra.mrb[4].mxu0 %v1976_v23  ;;  %2222 = vmatmul.mubr.bf16.gmra.mrb[4].mxu1 %v1980_v24 }
 0x511   : > { %v2211_v29 = vpop.f32.mrb[0].mxu0  ;;  %v2219_v30 = vpop.f32.mrb[0].mxu1 }
 0x512   : > { %v1572_v33 = vadd.f32 %v2211_v29, %v1399_v25  ;;  %v1580_v34 = vadd.f32 %v2219_v30, %v1407_v26  ;;  %v1507_v35 = vpop.f32.mrb[1].mxu0  ;;  %v1539_v36 = vpop.f32.mrb[1].mxu1 }
 0x513   : > { %v1570_v39 = vadd.f32 %v1507_v35, %v1397_v27  ;;  %v1578_v40 = vadd.f32 %v1539_v36, %v1405_v28  ;;  %v2212_v41 = vpop.f32.mrb[2].mxu0  ;;  %v2220_v42 = vpop.f32.mrb[2].mxu1 }
 0x514   : > { %1589 = vst.msk [vmem:[#allocation2 + $0x10] sm:$0xff] %vm1586_vm4, %v1572_v33  ;;  %1597 = vst.msk [vmem:[#allocation2 + $0x50] sm:$0xff] %vm1586_vm4, %v1580_v34  ;;  %v1573_v43 = vadd.f32 %v2212_v41, %v1400_v31  ;;  %v1581_v44 = vadd.f32 %v2220_v42, %v1408_v32  ;;  %v1510_v45 = vpop.f32.mrb[3].mxu0  ;;  %v1542_v46 = vpop.f32.mrb[3].mxu1 }
 0x515   : > { %1587 = vst.msk [vmem:[#allocation2] sm:$0xff] %vm1586_vm4, %v1570_v39  ;;  %1595 = vst.msk [vmem:[#allocation2 + $0x40] sm:$0xff] %vm1586_vm4, %v1578_v40  ;;  %v1571_v47 = vadd.f32 %v1510_v45, %v1398_v37  ;;  %v1579_v48 = vadd.f32 %v1542_v46, %v1406_v38 }
 0x516   : > { %1590 = vst.msk [vmem:[#allocation2 + $0x18] sm:$0xff] %vm1586_vm4, %v1573_v43  ;;  %1598 = vst.msk [vmem:[#allocation2 + $0x58] sm:$0xff] %vm1586_vm4, %v1581_v44 }
 0x517   : > { %1588 = vst.msk [vmem:[#allocation2 + $0x8] sm:$0xff] %vm1586_vm4, %v1571_v47  ;;  %1596 = vst.msk [vmem:[#allocation2 + $0x48] sm:$0xff] %vm1586_vm4, %v1579_v48 }
 0x519   : > { %v2215_v53 = vpop.f32.mrb[4].mxu0  ;;  %v2223_v54 = vpop.f32.mrb[4].mxu1 }
 0x51a   : > { %v1576_v9 = vadd.f32 %v2215_v53, %v1403_v49  ;;  %v1584_v10 = vadd.f32 %v2223_v54, %v1411_v50  ;;  %v1523_v11 = vpop.f32.mrb[5].mxu0  ;;  %v1555_v12 = vpop.f32.mrb[5].mxu1 }
 0x51b   : > { %v1574_v15 = vadd.f32 %v1523_v11, %v1401_v51  ;;  %v1582_v16 = vadd.f32 %v1555_v12, %v1409_v52  ;;  %v2216_v17 = vpop.f32.mrb[6].mxu0  ;;  %v2224_v18 = vpop.f32.mrb[6].mxu1 }
 0x51c   : > { %1593 = vst.msk [vmem:[#allocation2 + $0x30] sm:$0xff] %vm1586_vm4, %v1576_v9  ;;  %1601 = vst.msk [vmem:[#allocation2 + $0x70] sm:$0xff] %vm1586_vm4, %v1584_v10  ;;  %v1577_v19 = vadd.f32 %v2216_v17, %v1404_v55  ;;  %v1585_v20 = vadd.f32 %v2224_v18, %v1412_v56  ;;  %v1526_v21 = vpop.f32.mrb[7].mxu0  ;;  %v1558_v22 = vpop.f32.mrb[7].mxu1 }
 0x51d   : > { %1591 = vst.msk [vmem:[#allocation2 + $0x20] sm:$0xff] %vm1586_vm4, %v1574_v15  ;;  %1599 = vst.msk [vmem:[#allocation2 + $0x60] sm:$0xff] %vm1586_vm4, %v1582_v16  ;;  %v1575_v23 = vadd.f32 %v1526_v21, %v1402_v13  ;;  %v1583_v24 = vadd.f32 %v1558_v22, %v1410_v14 }
 0x51e   : > { %1594 = vst.msk [vmem:[#allocation2 + $0x38] sm:$0xff] %vm1586_vm4, %v1577_v19  ;;  %1602 = vst.msk [vmem:[#allocation2 + $0x78] sm:$0xff] %vm1586_vm4, %v1585_v20 }
 0x51f   : > { %1592 = vst.msk [vmem:[#allocation2 + $0x28] sm:$0xff] %vm1586_vm4, %v1575_v23  ;;  %1600 = vst.msk [vmem:[#allocation2 + $0x68] sm:$0xff] %vm1586_vm4, %v1583_v24 }
 0x520 PF: > { %p1981_p2 = scmp.ne.s32.totalorder %s2440_s24, 1 }
 0x521   : > { %s1622_s18 = sshra.s32 (!%p1981_p2), %s1970_s9, 4  ;;  %v1983_v25 = vcombine.low (!%p1981_p2), %v2890_v57, %v2893_v58  ;;  %v1987_v26 = vcombine.low (!%p1981_p2), %v2914_v1, %v2917_v2  ;;  %v1984_v31 = vcombine.low (!%p1981_p2), %v2896_v59, %v2899_v60  ;;  %v1988_v32 = vcombine.low (!%p1981_p2), %v2920_v3, %v2923_v4  ;;  %v1608_v60 = vld [vmem:[#allocation3 + $0x10] sm:$0xff] (!%p1981_p2)  ;;  %v1606_v4 = vld [vmem:[#allocation3] sm:$0xff] (!%p1981_p2)  ;;  %v1607_v41 = vld [vmem:[#allocation3 + $0x8] sm:$0xff] (!%p1981_p2) }
 0x522   : > { %1605 = sbr.rel (%p1981_p2) target bundleno = 1575 (0x627), region = 101  ;;  %s1982_s12 = sshll.u32 (!%p1981_p2), %s1622_s18, 3  ;;  %v1985_v33 = vcombine.low (!%p1981_p2), %v2902_v61, %v2905_v62  ;;  %v1989_v34 = vcombine.low (!%p1981_p2), %v2926_v5, %v2929_v6  ;;  %v1986_v35 = vcombine.low (!%p1981_p2), %v2908_v63, %v2911_v0  ;;  %v1990_v59 = vcombine.low (!%p1981_p2), %v2932_v7, %v2935_v8  ;;  %v1616_v3 = vld [vmem:[#allocation3 + $0x50] sm:$0xff] (!%p1981_p2)  ;;  %v1614_v36 = vld [vmem:[#allocation3 + $0x40] sm:$0xff] (!%p1981_p2)  ;;  %v1609_v5 = vld [vmem:[#allocation3 + $0x18] sm:$0xff] (!%p1981_p2) }
 0x523   : > { %2241 = vmatprep.mubr.bf16.mxu0 (!%p1981_p2), %v1983_v25  ;;  %2249 = vmatprep.mubr.bf16.mxu1 (!%p1981_p2), %v1987_v26  ;;  %s2990_s13 = scalar_lea.vmem (!%p1981_p2), [#allocation5], %s1982_s12  ;;  %vm1795_vm5 = vcmask (!%p1981_p2), 130048   ;;  %v1617_v6 = vld [vmem:[#allocation3 + $0x58] sm:$0xff] (!%p1981_p2)  ;;  %v1615_v63 = vld [vmem:[#allocation3 + $0x48] sm:$0xff] (!%p1981_p2)  ;;  %v1612_v49 = vld [vmem:[#allocation3 + $0x30] sm:$0xff] (!%p1981_p2) }
 0x524   : > { %v1626_v27 = vld [vmem:[%s2990_s13] sm:$0xff] (!%p1981_p2)  ;;  %v1627_v28 = vld [vmem:[%s2990_s13 + $0x8] sm:$0xff] (!%p1981_p2)  ;;  %v1628_v57 = vld [vmem:[%s2990_s13 + $0x10] sm:$0xff] (!%p1981_p2) }
 0x525   : > { %2225 = vmatprep.subr.bf16.mxu0 (!%p1981_p2), %v1626_v27  ;;  %2317 = vmatprep.subr.bf16.mxu1 (!%p1981_p2), %v1626_v27  ;;  %v1629_v58 = vld [vmem:[%s2990_s13 + $0x18] sm:$0xff] (!%p1981_p2)  ;;  %v1630_v1 = vld [vmem:[%s2990_s13 + $0x20] sm:$0xff] (!%p1981_p2)  ;;  %v1631_v2 = vld [vmem:[%s2990_s13 + $0x28] sm:$0xff] (!%p1981_p2) }
 0x526   : > { %2226 = vmatpush3.bf16.msra.mxu0 (!%p1981_p2), %v1626_v27  ;;  %2325 = vmatpush3.bf16.msra.mxu1 (!%p1981_p2), %v1626_v27  ;;  %v1632_v29 = vld [vmem:[%s2990_s13 + $0x30] sm:$0xff] (!%p1981_p2)  ;;  %v1633_v30 = vld [vmem:[%s2990_s13 + $0x38] sm:$0xff] (!%p1981_p2)  ;;  %v1610_v51 = vld [vmem:[#allocation3 + $0x20] sm:$0xff] (!%p1981_p2) }
 0x527   : > { %2227 = vmatprep.subr.bf16.mxu0 (!%p1981_p2), %v1627_v28  ;;  %2318 = vmatprep.subr.bf16.mxu1 (!%p1981_p2), %v1627_v28  ;;  %v1620_v50 = vld [vmem:[#allocation3 + $0x70] sm:$0xff] (!%p1981_p2)  ;;  %v1618_v52 = vld [vmem:[#allocation3 + $0x60] sm:$0xff] (!%p1981_p2)  ;;  %v1613_v55 = vld [vmem:[#allocation3 + $0x38] sm:$0xff] (!%p1981_p2) }
 0x528   : > { %v1621_v56 = vld [vmem:[#allocation3 + $0x78] sm:$0xff] (!%p1981_p2)  ;;  %v1611_v13 = vld [vmem:[#allocation3 + $0x28] sm:$0xff] (!%p1981_p2) }
 0x529   : > { %v1619_v14 = vld [vmem:[#allocation3 + $0x68] sm:$0xff] }
 0x52a   : > { %2228 = vmatpush3.bf16.msra.mxu0 %v1627_v28  ;;  %2326 = vmatpush3.bf16.msra.mxu1 %v1627_v28 }
 0x52b   : > { %2229 = vmatprep.subr.bf16.mxu0 %v1628_v57  ;;  %2319 = vmatprep.subr.bf16.mxu1 %v1628_v57 }
 0x52e   : > { %2230 = vmatpush3.bf16.msra.mxu0 %v1628_v57  ;;  %2327 = vmatpush3.bf16.msra.mxu1 %v1628_v57 }
 0x52f   : > { %2231 = vmatprep.subr.bf16.mxu0 %v1629_v58  ;;  %2320 = vmatprep.subr.bf16.mxu1 %v1629_v58 }
 0x532   : > { %2232 = vmatpush3.bf16.msra.mxu0 %v1629_v58  ;;  %2328 = vmatpush3.bf16.msra.mxu1 %v1629_v58 }
 0x533   : > { %2233 = vmatprep.subr.bf16.mxu0 %v1630_v1  ;;  %2321 = vmatprep.subr.bf16.mxu1 %v1630_v1 }
 0x536   : > { %2234 = vmatpush3.bf16.msra.mxu0 %v1630_v1  ;;  %2329 = vmatpush3.bf16.msra.mxu1 %v1630_v1 }
 0x537   : > { %2235 = vmatprep.subr.bf16.mxu0 %v1631_v2  ;;  %2322 = vmatprep.subr.bf16.mxu1 %v1631_v2 }
 0x53a   : > { %2236 = vmatpush3.bf16.msra.mxu0 %v1631_v2  ;;  %2330 = vmatpush3.bf16.msra.mxu1 %v1631_v2 }
 0x53b   : > { %2237 = vmatprep.subr.bf16.mxu0 %v1632_v29  ;;  %2323 = vmatprep.subr.bf16.mxu1 %v1632_v29 }
 0x53e   : > { %2238 = vmatpush3.bf16.msra.mxu0 %v1632_v29  ;;  %2331 = vmatpush3.bf16.msra.mxu1 %v1632_v29 }
 0x53f   : > { %2239 = vmatprep.subr.bf16.mxu0 %v1633_v30  ;;  %2324 = vmatprep.subr.bf16.mxu1 %v1633_v30 }
 0x542   : > { %2240 = vmatpush3.bf16.msra.mxu0 %v1633_v30  ;;  %2332 = vmatpush3.bf16.msra.mxu1 %v1633_v30 }
 0x545   : > { %2242 = vmatmul.mubr.bf16.vlgmr.msra.gmra.mrb[0].mxu0 %v1984_v31  ;;  %2250 = vmatmul.mubr.bf16.vlgmr.msra.gmra.mrb[0].mxu1 %v1988_v32 }
 0x546   : > { %2245 = vmatprep.mubr.bf16.mxu0 %v1985_v33  ;;  %2253 = vmatprep.mubr.bf16.mxu1 %v1989_v34 }
 0x54d   : > { %2246 = vmatmul.mubr.bf16.gmra.mrb[4].mxu0 %v1986_v35  ;;  %2254 = vmatmul.mubr.bf16.gmra.mrb[4].mxu1 %v1990_v59 }
 0x618   : > { %v2243_v61 = vpop.f32.mrb[0].mxu0  ;;  %v2251_v62 = vpop.f32.mrb[0].mxu1 }
 0x619   : > { %v1781_v37 = vadd.f32 %v2243_v61, %v1608_v60  ;;  %v1789_v38 = vadd.f32 %v2251_v62, %v1616_v3  ;;  %v1716_v39 = vpop.f32.mrb[1].mxu0  ;;  %v1748_v40 = vpop.f32.mrb[1].mxu1 }
 0x61a   : > { %v1779_v0 = vadd.f32 %v1716_v39, %v1606_v4  ;;  %v1787_v42 = vadd.f32 %v1748_v40, %v1614_v36  ;;  %v2244_v7 = vpop.f32.mrb[2].mxu0  ;;  %v2252_v8 = vpop.f32.mrb[2].mxu1 }
 0x61b   : > { %1798 = vst.msk [vmem:[#allocation3 + $0x10] sm:$0xff] %vm1795_vm5, %v1781_v37  ;;  %1806 = vst.msk [vmem:[#allocation3 + $0x50] sm:$0xff] %vm1795_vm5, %v1789_v38  ;;  %v1782_v43 = vadd.f32 %v2244_v7, %v1609_v5  ;;  %v1790_v44 = vadd.f32 %v2252_v8, %v1617_v6  ;;  %v1719_v45 = vpop.f32.mrb[3].mxu0  ;;  %v1751_v46 = vpop.f32.mrb[3].mxu1 }
 0x61c   : > { %1796 = vst.msk [vmem:[#allocation3] sm:$0xff] %vm1795_vm5, %v1779_v0  ;;  %1804 = vst.msk [vmem:[#allocation3 + $0x40] sm:$0xff] %vm1795_vm5, %v1787_v42  ;;  %v1780_v47 = vadd.f32 %v1719_v45, %v1607_v41  ;;  %v1788_v48 = vadd.f32 %v1751_v46, %v1615_v63 }
 0x61d   : > { %1799 = vst.msk [vmem:[#allocation3 + $0x18] sm:$0xff] %vm1795_vm5, %v1782_v43  ;;  %1807 = vst.msk [vmem:[#allocation3 + $0x58] sm:$0xff] %vm1795_vm5, %v1790_v44 }
 0x61e   : > { %1797 = vst.msk [vmem:[#allocation3 + $0x8] sm:$0xff] %vm1795_vm5, %v1780_v47  ;;  %1805 = vst.msk [vmem:[#allocation3 + $0x48] sm:$0xff] %vm1795_vm5, %v1788_v48 }
 0x620   : > { %v2247_v53 = vpop.f32.mrb[4].mxu0  ;;  %v2255_v54 = vpop.f32.mrb[4].mxu1 }
 0x621   : > { %v1785_v9 = vadd.f32 %v2247_v53, %v1612_v49  ;;  %v1793_v10 = vadd.f32 %v2255_v54, %v1620_v50  ;;  %v1732_v11 = vpop.f32.mrb[5].mxu0  ;;  %v1764_v12 = vpop.f32.mrb[5].mxu1 }
 0x622   : > { %v1783_v15 = vadd.f32 %v1732_v11, %v1610_v51  ;;  %v1791_v16 = vadd.f32 %v1764_v12, %v1618_v52  ;;  %v2248_v17 = vpop.f32.mrb[6].mxu0  ;;  %v2256_v18 = vpop.f32.mrb[6].mxu1 }
 0x623   : > { %1802 = vst.msk [vmem:[#allocation3 + $0x30] sm:$0xff] %vm1795_vm5, %v1785_v9  ;;  %1810 = vst.msk [vmem:[#allocation3 + $0x70] sm:$0xff] %vm1795_vm5, %v1793_v10  ;;  %v1786_v19 = vadd.f32 %v2248_v17, %v1613_v55  ;;  %v1794_v20 = vadd.f32 %v2256_v18, %v1621_v56  ;;  %v1735_v21 = vpop.f32.mrb[7].mxu0  ;;  %v1767_v22 = vpop.f32.mrb[7].mxu1 }
 0x624   : > { %1800 = vst.msk [vmem:[#allocation3 + $0x20] sm:$0xff] %vm1795_vm5, %v1783_v15  ;;  %1808 = vst.msk [vmem:[#allocation3 + $0x60] sm:$0xff] %vm1795_vm5, %v1791_v16  ;;  %v1784_v23 = vadd.f32 %v1735_v21, %v1611_v13  ;;  %v1792_v24 = vadd.f32 %v1767_v22, %v1619_v14 }
 0x625   : > { %1803 = vst.msk [vmem:[#allocation3 + $0x38] sm:$0xff] %vm1795_vm5, %v1786_v19  ;;  %1811 = vst.msk [vmem:[#allocation3 + $0x78] sm:$0xff] %vm1795_vm5, %v1794_v20 }
 0x626   : > { %1801 = vst.msk [vmem:[#allocation3 + $0x28] sm:$0xff] %vm1795_vm5, %v1784_v23  ;;  %1809 = vst.msk [vmem:[#allocation3 + $0x68] sm:$0xff] %vm1795_vm5, %v1792_v24 }
 0x627 PF: > { %p1812_p3 = scmp.eq.s32.totalorder %s2436_s23, 2 }
 0x629   : > { %p1813_p4 = pnand %p1812_p3, %p1013_p13 }
 0x62a   : > { %v1817_v25 = vld [vmem:[#allocation3] sm:$0xff] (!%p1813_p4)  ;;  %vm1849_vm6 = vcmask (!%p1813_p4), 130048   ;;  %v1818_v26 = vld [vmem:[#allocation3 + $0x8] sm:$0xff] (!%p1813_p4)  ;;  %v1819_v27 = vld [vmem:[#allocation3 + $0x10] sm:$0xff] (!%p1813_p4) }
 0x62b   : > { %1816 = sbr.rel (%p1813_p4) target bundleno = 1590 (0x636), region = 105  ;;  %v1833_v28 = vmax.f32 (!%p1813_p4), %v1817_v25, 0.0  ;;  %v1834_v57 = vmax.f32 (!%p1813_p4), %v1818_v26, 0.0  ;;  %v1835_v58 = vmax.f32 (!%p1813_p4), %v1819_v27, 0.0  ;;  %v1820_v1 = vld [vmem:[#allocation3 + $0x18] sm:$0xff] (!%p1813_p4)  ;;  %v1821_v2 = vld [vmem:[#allocation3 + $0x20] sm:$0xff] (!%p1813_p4) }
 0x62c   : > { %v1836_v30 = vmax.f32 (!%p1813_p4), %v1820_v1, 0.0  ;;  %v1837_v31 = vmax.f32 (!%p1813_p4), %v1821_v2, 0.0  ;;  %v1823_v33 = vld [vmem:[#allocation3 + $0x30] sm:$0xff] (!%p1813_p4)  ;;  %v1824_v34 = vld [vmem:[#allocation3 + $0x38] sm:$0xff] (!%p1813_p4)  ;;  %v1825_v35 = vld [vmem:[#allocation3 + $0x40] sm:$0xff] (!%p1813_p4) }
 0x62d   : > { %v1822_v29 = vld [vmem:[#allocation3 + $0x28] sm:$0xff] (!%p1813_p4)  ;;  %1850 = vst.msk [vmem:[%s3122_s6] sm:$0xff] (!%p1813_p4), %vm1849_vm6, %v1833_v28  ;;  %1851 = vst.msk [vmem:[%s3122_s6 + $0x8] sm:$0xff] (!%p1813_p4), %vm1849_vm6, %v1834_v57  ;;  %v1839_v59 = vmax.f32 (!%p1813_p4), %v1823_v33, 0.0  ;;  %v1840_v60 = vmax.f32 (!%p1813_p4), %v1824_v34, 0.0  ;;  %v1841_v3 = vmax.f32 (!%p1813_p4), %v1825_v35, 0.0 }
 0x62e   : > { %v1838_v32 = vmax.f32 (!%p1813_p4), %v1822_v29, 0.0  ;;  %1852 = vst.msk [vmem:[%s3122_s6 + $0x10] sm:$0xff] (!%p1813_p4), %vm1849_vm6, %v1835_v58  ;;  %v1826_v4 = vld [vmem:[#allocation3 + $0x48] sm:$0xff] (!%p1813_p4)  ;;  %v1827_v36 = vld [vmem:[#allocation3 + $0x50] sm:$0xff] (!%p1813_p4)  ;;  %v1828_v61 = vld [vmem:[#allocation3 + $0x58] sm:$0xff] (!%p1813_p4) }
 0x62f   : > { %1853 = vst.msk [vmem:[%s3122_s6 + $0x18] sm:$0xff] (!%p1813_p4), %vm1849_vm6, %v1836_v30  ;;  %1854 = vst.msk [vmem:[%s3122_s6 + $0x20] sm:$0xff] (!%p1813_p4), %vm1849_vm6, %v1837_v31  ;;  %v1842_v62 = vmax.f32 (!%p1813_p4), %v1826_v4, 0.0  ;;  %v1843_v5 = vmax.f32 (!%p1813_p4), %v1827_v36, 0.0  ;;  %v1844_v6 = vmax.f32 (!%p1813_p4), %v1828_v61, 0.0  ;;  %v1829_v37 = vld [vmem:[#allocation3 + $0x60] sm:$0xff] (!%p1813_p4) }
 0x630   : > { %1855 = vst.msk [vmem:[%s3122_s6 + $0x28] sm:$0xff] (!%p1813_p4), %vm1849_vm6, %v1838_v32  ;;  %v1830_v38 = vld [vmem:[#allocation3 + $0x68] sm:$0xff] (!%p1813_p4)  ;;  %v1831_v39 = vld [vmem:[#allocation3 + $0x70] sm:$0xff] (!%p1813_p4)  ;;  %1856 = vst.msk [vmem:[%s3122_s6 + $0x30] sm:$0xff] (!%p1813_p4), %vm1849_vm6, %v1839_v59  ;;  %v1845_v40 = vmax.f32 (!%p1813_p4), %v1829_v37, 0.0 }
 0x631   : > { %1857 = vst.msk [vmem:[%s3122_s6 + $0x38] sm:$0xff] (!%p1813_p4), %vm1849_vm6, %v1840_v60  ;;  %1858 = vst.msk [vmem:[%s3122_s6 + $0x40] sm:$0xff] (!%p1813_p4), %vm1849_vm6, %v1841_v3  ;;  %v1846_v41 = vmax.f32 (!%p1813_p4), %v1830_v38, 0.0  ;;  %v1847_v63 = vmax.f32 (!%p1813_p4), %v1831_v39, 0.0  ;;  %v1832_v0 = vld [vmem:[#allocation3 + $0x78] sm:$0xff] (!%p1813_p4) }
 0x632   : > { %1859 = vst.msk [vmem:[%s3122_s6 + $0x48] sm:$0xff] %vm1849_vm6, %v1842_v62  ;;  %1860 = vst.msk [vmem:[%s3122_s6 + $0x50] sm:$0xff] %vm1849_vm6, %v1843_v5  ;;  %v1848_v42 = vmax.f32 %v1832_v0, 0.0 }
 0x633   : > { %1861 = vst.msk [vmem:[%s3122_s6 + $0x58] sm:$0xff] %vm1849_vm6, %v1844_v6  ;;  %1862 = vst.msk [vmem:[%s3122_s6 + $0x60] sm:$0xff] %vm1849_vm6, %v1845_v40 }
 0x634   : > { %1863 = vst.msk [vmem:[%s3122_s6 + $0x68] sm:$0xff] %vm1849_vm6, %v1846_v41  ;;  %1864 = vst.msk [vmem:[%s3122_s6 + $0x70] sm:$0xff] %vm1849_vm6, %v1847_v63 }
 0x635   : > { %1865 = vst.msk [vmem:[%s3122_s6 + $0x78] sm:$0xff] %vm1849_vm6, %v1848_v42 }
 0x636 PF: > { %s16_s27 = sadd.s32 1, %s2452_s27   ;;  %s3123_s21 = smov %s2432_s22 }
 0x637   : > { %p13_p5 = scmp.ge.s32.totalorder %s16_s27, 8   ;;  %s3124_s22 = smov %s2545_s8 }
 0x638   : > { %s3125_s23 = smov %s2444_s25  ;;  %s3126_s24 = smov %s2448_s26 }
 0x639   : > { %s3127_s25 = smov %s3130_s28  ;;  %s3128_s26 = smov %s3134_s29 }
 0x63a   :  { %15 = sbr.rel (!%p13_p5) target bundleno = 4 (0x4), region = 138 }

</bundles_post_ra>
